<compile_context>
chip_gen: v6e
topology: v6e:2x2x1
jax: 0.10.0
libtpu: 0.0.40
codegen_flags: <defaults>
</compile_context>

<pallas_src>
import numpy as np

import jax
import jax.numpy as jnp
from jax import lax
from jax.experimental import pallas as pl
from jax.experimental.pallas import tpu as pltpu

# Architecture sizes (same synthetic generator as before).
Z_DIM = 32                  # latent dim
C0, H0, W0 = 16, 4, 4       # feature map after the FC stem
C1 = 8                      # hidden channels after conv1
C_OUT = 4                   # output image channels
H1 = W1 = 8                 # spatial after first 2x nearest upsample
H_OUT = W_OUT = 16          # spatial after second 2x nearest upsample
S0 = H0 * W0                # 16
S1 = H1 * W1                # 64
S1P = 128                   # stage-1 spatial padded to one full lane width
S2 = H_OUT * W_OUT          # 256

_TAPS = [(dh, dw) for dh in (-1, 0, 1) for dw in (-1, 0, 1)]


# ----------------------------------------------------------------------------------
# In-kernel helpers
# ----------------------------------------------------------------------------------
def _conv3x3(x, w_mat, b_col, mask, wdt, sp, act):
    """3x3 'same' conv; channels on sublanes, (padded) spatial on lanes.

    x:     (Cin, sp) f32, only the first hgt*wdt lanes are meaningful (rest zero).
    w_mat: (Cout, 9*Cin) im2col weights, tap-major / channel-minor.
    mask:  (9, sp) precomputed 0/1 boundary masks (also zero in padded lanes).
    The 9 lane shifts ride the XLU via pltpu.roll; ONE MXU matmul per conv.
    """
    blocks = []
    for k, (dh, dw) in enumerate(_TAPS):
        delta = dh * wdt + dw
        if delta == 0:
            blocks.append(x)                               # center tap: mask is identity
        else:
            shifted = pltpu.roll(x, (-delta) % sp, axis=1)  # shifted[:, s] = x[:, s+delta]
            blocks.append(shifted * mask[k:k + 1, :])
    patches = jnp.concatenate(blocks, axis=0)               # (9*Cin, sp), sublane-aligned
    y = jnp.dot(w_mat, patches, preferred_element_type=jnp.float32) + b_col
    return jnp.maximum(y, 0.0) if act == "relu" else jnp.tanh(y)


def generator_kernel(trunc_ref, z_ref, wfc_ref, bfc_ref, gsel_ref, su0_ref,
                     w1_ref, b1_ref, m1_ref, u1_ref, w2_ref, b2_ref, m2_ref,
                     out_ref):
    # ---- FC stem: relu(trunc * z @ Wfc + bfc) -> (1, C0*S0) -----------------------
    # TODO(synk): truncation trick approximated as latent scaling (not truncated
    # resampling); real G.test(z, truncation) semantics are opaque in the reference.
    z = z_ref[0] * trunc_ref[0, 0]                                        # (1, Z)
    h = jnp.dot(z, wfc_ref[...], preferred_element_type=jnp.float32) + bfc_ref[...]
    h = jnp.maximum(h, 0.0)                                               # (1, C0*S0)

    # ---- Channel-major relayout fused with the first 2x nearest upsample ----------
    # x1[c, s1] = h[0, c*S0 + src(s1)]; gsel/su0 are precomputed host constants.
    x1 = jnp.dot(gsel_ref[...] * h, su0_ref[...],
                 preferred_element_type=jnp.float32)                      # (C0, S1P)

    # ---- conv1 3x3 same + relu (single im2col matmul, rolls on XLU) ---------------
    a1 = _conv3x3(x1, w1_ref[...], b1_ref[...], m1_ref[...], W1, S1P, "relu")

    # ---- second 2x nearest upsample (8x8 -> 16x16), precomputed 0/1 matrix --------
    x2 = jnp.dot(a1, u1_ref[...], preferred_element_type=jnp.float32)     # (C1, S2)

    # ---- conv2 3x3 same + tanh ----------------------------------------------------
    a2 = _conv3x3(x2, w2_ref[...], b2_ref[...], m2_ref[...], W_OUT, S2, "tanh")

    # Direct lane-dense store (256 lanes, unmasked); no concat, no extra temporary.
    out_ref[0, :, :] = a2


# ----------------------------------------------------------------------------------
# Host-side constant / parameter packing (all 0/1 matrices built here, NOT in-kernel)
# ----------------------------------------------------------------------------------
def build_constants():
    jcol = np.arange(C0 * S0)

    # gsel[c, j] = 1 iff FC-output column j belongs to channel c.
    gsel = (jcol[None, :] // S0 == np.arange(C0)[:, None]).astype(np.float32)

    # su0[j, s] = 1 iff (j % S0) is the 4x4 source pixel of 8x8 pixel s  (s < S1);
    # columns S1..S1P-1 are zero padding so every lane dim stays a multiple of 128.
    s = np.arange(S1P)
    hh1, ww1 = s // W1, s % W1
    src1 = (hh1 // 2) * W0 + (ww1 // 2)
    su0 = ((jcol[:, None] % S0 == src1[None, :]) & (s[None, :] < S1)).astype(np.float32)

    # u1[s1, s2] = 1 iff s1 (< S1) is the 8x8 source pixel of 16x16 pixel s2.
    s2 = np.arange(S2)
    hh2, ww2 = s2 // W_OUT, s2 % W_OUT
    src2 = (hh2 // 2) * W1 + (ww2 // 2)
    row = np.arange(S1P)
    u1 = ((row[:, None] == src2[None, :]) & (row[:, None] < S1)).astype(np.float32)

    # Per-tap conv boundary masks (zero where h+dh / w+dw fall outside, or in padding).
    def _masks(hgt, wdt, sp):
        pos = np.arange(sp)
        hh, ww = pos // wdt, pos % wdt
        rows = []
        for dh, dw in _TAPS:
            ok = ((hh + dh >= 0) & (hh + dh < hgt) &
                  (ww + dw >= 0) & (ww + dw < wdt) & (pos < hgt * wdt))
            rows.append(ok)
        return np.stack(rows, 0).astype(np.float32)

    return (jnp.asarray(gsel), jnp.asarray(su0), jnp.asarray(u1),
            jnp.asarray(_masks(H1, W1, S1P)), jnp.asarray(_masks(H_OUT, W_OUT, S2)))


def init_raw_params(key):
    ks = jax.random.split(key, 6)
    scale = 0.1
    return {
        "w_fc": scale * jax.random.normal(ks[0], (Z_DIM, C0 * S0), jnp.float32),
        "b_fc": scale * jax.random.normal(ks[1], (C0 * S0,), jnp.float32),
        "w1": scale * jax.random.normal(ks[2], (3, 3, C0, C1), jnp.float32),   # HWIO
        "b1": scale * jax.random.normal(ks[3], (C1,), jnp.float32),
        "w2": scale * jax.random.normal(ks[4], (3, 3, C1, C_OUT), jnp.float32),
        "b2": scale * jax.random.normal(ks[5], (C_OUT,), jnp.float32),
    }


def pack_params(raw):
    """Repack raw (HWIO) weights into the kernel's MXU-friendly im2col layouts."""
    w1 = jnp.transpose(raw["w1"], (3, 0, 1, 2)).reshape(C1, 9 * C0)       # (Cout, k*Cin+ci)
    w2 = jnp.transpose(raw["w2"], (3, 0, 1, 2)).reshape(C_OUT, 9 * C1)
    return {
        "w_fc": raw["w_fc"],
        "b_fc": raw["b_fc"].reshape(1, C0 * S0),
        "w1": w1, "b1": raw["b1"].reshape(C1, 1),
        "w2": w2, "b2": raw["b2"].reshape(C_OUT, 1),
    }


# ----------------------------------------------------------------------------------
# Wrapper
# ----------------------------------------------------------------------------------
def generator_forward(params, consts, z, truncation=0.5):
    batch = z.shape[0]
    trunc = jnp.full((1, 1), truncation, jnp.float32)
    gsel, su0, u1, m1, m2 = consts
    z3 = z.reshape(batch, 1, Z_DIM)   # leading batch dim so blocks keep full minor dims

    flops = int(2 * batch * (Z_DIM * C0 * S0          # FC stem
                             + C0 * (C0 * S0) * S1P   # relayout+upsample matmul
                             + C1 * 9 * C0 * S1P      # conv1 im2col matmul
                             + C1 * S1P * S2          # upsample 2
                             + C_OUT * 9 * C1 * S2))  # conv2 im2col matmul
    const_bytes = sum(int(c.size) for c in consts) * 4
    param_bytes = sum(int(p.size) for p in params.values()) * 4
    bytes_accessed = int(4 * (z.size + batch * C_OUT * S2) + param_bytes + const_bytes + 4)

    out = pl.pallas_call(
        generator_kernel,
        grid=(batch,),
        out_shape=jax.ShapeDtypeStruct((batch, C_OUT, S2), jnp.float32),
        in_specs=[
            pl.BlockSpec(memory_space=pltpu.SMEM),                      # truncation scalar
            pl.BlockSpec((1, 1, Z_DIM), lambda b: (b, 0, 0)),           # z (one sample)
            pl.BlockSpec((Z_DIM, C0 * S0), lambda b: (0, 0)),           # w_fc
            pl.BlockSpec((1, C0 * S0), lambda b: (0, 0)),               # b_fc
            pl.BlockSpec((C0, C0 * S0), lambda b: (0, 0)),              # gsel   (const)
            pl.BlockSpec((C0 * S0, S1P), lambda b: (0, 0)),             # su0    (const)
            pl.BlockSpec((C1, 9 * C0), lambda b: (0, 0)),               # w1
            pl.BlockSpec((C1, 1), lambda b: (0, 0)),                    # b1
            pl.BlockSpec((9, S1P), lambda b: (0, 0)),                   # mask1  (const)
            pl.BlockSpec((S1P, S2), lambda b: (0, 0)),                  # u1     (const)
            pl.BlockSpec((C_OUT, 9 * C1), lambda b: (0, 0)),            # w2
            pl.BlockSpec((C_OUT, 1), lambda b: (0, 0)),                 # b2
            pl.BlockSpec((9, S2), lambda b: (0, 0)),                    # mask2  (const)
        ],
        out_specs=pl.BlockSpec((1, C_OUT, S2), lambda b: (b, 0, 0)),
        compiler_params=pltpu.CompilerParams(
            dimension_semantics=("parallel",)),                         # v7x: 1 sample / TC
        cost_estimate=pl.CostEstimate(
            flops=flops,
            transcendentals=batch * C_OUT * S2,                         # tanh
            bytes_accessed=bytes_accessed),
    )(trunc, z3, params["w_fc"], params["b_fc"], gsel, su0,
      params["w1"], params["b1"], m1, u1, params["w2"], params["b2"], m2)

    # (B, C_OUT, H*W) -> (B, C_OUT, H, W): pure reshape, no data movement.
    return out.reshape(batch, C_OUT, H_OUT, W_OUT)


# Pure-JAX reference of the same synthetic generator (correctness oracle).
def reference_forward(raw, z, truncation):
    zt = z * truncation
    h = jax.nn.relu(zt @ raw["w_fc"] + raw["b_fc"][None, :])
    x = h.reshape(-1, C0, H0, W0)
    x = jnp.repeat(jnp.repeat(x, 2, axis=2), 2, axis=3)
    x = lax.conv_general_dilated(x, raw["w1"], (1, 1), "SAME",
                                 dimension_numbers=("NCHW", "HWIO", "NCHW"))
    x = jax.nn.relu(x + raw["b1"][None, :, None, None])
    x = jnp.repeat(jnp.repeat(x, 2, axis=2), 2, axis=3)
    x = lax.conv_general_dilated(x, raw["w2"], (1, 1), "SAME",
                                 dimension_numbers=("NCHW", "HWIO", "NCHW"))
    return jnp.tanh(x + raw["b2"][None, :, None, None])


if __name__ == "__main__":
    key = jax.random.PRNGKey(0)
    pkey, zkey = jax.random.split(key)
    raw = init_raw_params(pkey)
    params = pack_params(raw)
    consts = build_constants()
    z = jax.random.normal(zkey, (2, Z_DIM), jnp.float32)

    images = generator_forward(params, consts, z, truncation=0.5)
    images = jax.block_until_ready(images)

    assert images.shape == (2, C_OUT, H_OUT, W_OUT), images.shape
    assert bool(jnp.all(jnp.isfinite(images)))

    ref = reference_forward(raw, z, 0.5)
    max_err = float(jnp.max(jnp.abs(images - ref)))
    assert max_err < 5e-2, f"kernel mismatch vs pure-JAX reference: {max_err}"
    print("KERNEL_OK")
</pallas_src>

<mosaic_0001>
module attributes {stable_mosaic.version = 11 : i64} {
  func.func @generator_kernel(%arg0: i32, %arg1: memref<1x1xf32, #tpu.memory_space<smem>>, %arg2: memref<1x1x32xf32, #tpu.memory_space<vmem>>, %arg3: memref<32x256xf32, #tpu.memory_space<vmem>>, %arg4: memref<1x256xf32, #tpu.memory_space<vmem>>, %arg5: memref<16x256xf32, #tpu.memory_space<vmem>>, %arg6: memref<256x128xf32, #tpu.memory_space<vmem>>, %arg7: memref<8x144xf32, #tpu.memory_space<vmem>>, %arg8: memref<8x1xf32, #tpu.memory_space<vmem>>, %arg9: memref<9x128xf32, #tpu.memory_space<vmem>>, %arg10: memref<128x256xf32, #tpu.memory_space<vmem>>, %arg11: memref<4x72xf32, #tpu.memory_space<vmem>>, %arg12: memref<4x1xf32, #tpu.memory_space<vmem>>, %arg13: memref<9x256xf32, #tpu.memory_space<vmem>>, %arg14: memref<1x4x256xf32, #tpu.memory_space<vmem>>) attributes {dimension_semantics = [#tpu.dimension_semantics<parallel>], iteration_bounds = array<i64: 2>, scalar_prefetch = 0 : i64, scratch_operands = 0 : i64, tpu.core_type = #tpu.core_type<tc>, window_params = [{transform_indices = @transform_0, window_bounds = array<i64: 1, 1>}, {transform_indices = @transform_1, window_bounds = array<i64: 1, 1, 32>}, {pipeline_mode = #tpu.pipeline_mode<synchronous>, transform_indices = @transform_2, window_bounds = array<i64: 32, 256>}, {pipeline_mode = #tpu.pipeline_mode<synchronous>, transform_indices = @transform_3, window_bounds = array<i64: 1, 256>}, {pipeline_mode = #tpu.pipeline_mode<synchronous>, transform_indices = @transform_4, window_bounds = array<i64: 16, 256>}, {pipeline_mode = #tpu.pipeline_mode<synchronous>, transform_indices = @transform_5, window_bounds = array<i64: 256, 128>}, {pipeline_mode = #tpu.pipeline_mode<synchronous>, transform_indices = @transform_6, window_bounds = array<i64: 8, 144>}, {pipeline_mode = #tpu.pipeline_mode<synchronous>, transform_indices = @transform_7, window_bounds = array<i64: 8, 1>}, {pipeline_mode = #tpu.pipeline_mode<synchronous>, transform_indices = @transform_8, window_bounds = array<i64: 9, 128>}, {pipeline_mode = #tpu.pipeline_mode<synchronous>, transform_indices = @transform_9, window_bounds = array<i64: 128, 256>}, {pipeline_mode = #tpu.pipeline_mode<synchronous>, transform_indices = @transform_10, window_bounds = array<i64: 4, 72>}, {pipeline_mode = #tpu.pipeline_mode<synchronous>, transform_indices = @transform_11, window_bounds = array<i64: 4, 1>}, {pipeline_mode = #tpu.pipeline_mode<synchronous>, transform_indices = @transform_12, window_bounds = array<i64: 9, 256>}, {transform_indices = @transform_13, window_bounds = array<i64: 1, 4, 256>}]} {
    %c0 = arith.constant 0 : index
    %c0_0 = arith.constant 0 : index
    %c0_1 = arith.constant 0 : index
    %0 = vector.load %arg2[%c0, %c0_0, %c0_1] : memref<1x1x32xf32, #tpu.memory_space<vmem>>, vector<1x1x32xf32>
    %1 = vector.shape_cast %0 : vector<1x1x32xf32> to vector<1x32xf32>
    %c0_2 = arith.constant 0 : index
    %c0_3 = arith.constant 0 : index
    %2 = memref.load %arg1[%c0_2, %c0_3] : memref<1x1xf32, #tpu.memory_space<smem>>
    %3 = vector.broadcast %2 : f32 to vector<1x32xf32>
    %4 = arith.mulf %1, %3 : vector<1x32xf32>
    %c0_4 = arith.constant 0 : index
    %c0_5 = arith.constant 0 : index
    %5 = vector.load %arg3[%c0_4, %c0_5] : memref<32x256xf32, #tpu.memory_space<vmem>>, vector<32x256xf32>
    %cst = arith.constant dense<0.000000e+00> : vector<1x256xf32>
    %6 = tpu.matmul %4, %5, %cst {dimension_numbers = #tpu.dot_dimension_numbers<[1], [0], [0], [1], [0, 0, 1, 1], [], []>} : vector<1x32xf32>, vector<32x256xf32>, vector<1x256xf32> -> vector<1x256xf32>
    %c0_6 = arith.constant 0 : index
    %c0_7 = arith.constant 0 : index
    %7 = vector.load %arg4[%c0_6, %c0_7] : memref<1x256xf32, #tpu.memory_space<vmem>>, vector<1x256xf32>
    %8 = arith.addf %6, %7 : vector<1x256xf32>
    %cst_8 = arith.constant 0.000000e+00 : f32
    %9 = vector.broadcast %cst_8 : f32 to vector<1x256xf32>
    %10 = arith.maximumf %8, %9 : vector<1x256xf32>
    %c0_9 = arith.constant 0 : index
    %c0_10 = arith.constant 0 : index
    %11 = vector.load %arg5[%c0_9, %c0_10] : memref<16x256xf32, #tpu.memory_space<vmem>>, vector<16x256xf32>
    %12 = vector.broadcast %10 : vector<1x256xf32> to vector<16x256xf32>
    %13 = arith.mulf %11, %12 : vector<16x256xf32>
    %c0_11 = arith.constant 0 : index
    %c0_12 = arith.constant 0 : index
    %14 = vector.load %arg6[%c0_11, %c0_12] : memref<256x128xf32, #tpu.memory_space<vmem>>, vector<256x128xf32>
    %cst_13 = arith.constant dense<0.000000e+00> : vector<16x128xf32>
    %15 = tpu.matmul %13, %14, %cst_13 {dimension_numbers = #tpu.dot_dimension_numbers<[1], [0], [0], [1], [0, 0, 1, 1], [], []>} : vector<16x256xf32>, vector<256x128xf32>, vector<16x128xf32> -> vector<16x128xf32>
    %c0_14 = arith.constant 0 : index
    %c0_15 = arith.constant 0 : index
    %16 = vector.load %arg7[%c0_14, %c0_15] : memref<8x144xf32, #tpu.memory_space<vmem>>, vector<8x144xf32>
    %c0_16 = arith.constant 0 : index
    %c0_17 = arith.constant 0 : index
    %17 = vector.load %arg8[%c0_16, %c0_17] : memref<8x1xf32, #tpu.memory_space<vmem>>, vector<8x1xf32>
    %c0_18 = arith.constant 0 : index
    %c0_19 = arith.constant 0 : index
    %18 = vector.load %arg9[%c0_18, %c0_19] : memref<9x128xf32, #tpu.memory_space<vmem>>, vector<9x128xf32>
    %c9_i32 = arith.constant 9 : i32
    %19 = tpu.dynamic_rotate %15 by %c9_i32 dim 1 : vector<16x128xf32>, i32 -> vector<16x128xf32>
    %20 = vector.extract_strided_slice %18 {offsets = [0, 0], sizes = [1, 128], strides = [1, 1]} : vector<9x128xf32> to vector<1x128xf32>
    %21 = vector.broadcast %20 : vector<1x128xf32> to vector<16x128xf32>
    %22 = arith.mulf %19, %21 : vector<16x128xf32>
    %c8_i32 = arith.constant 8 : i32
    %23 = tpu.dynamic_rotate %15 by %c8_i32 dim 1 : vector<16x128xf32>, i32 -> vector<16x128xf32>
    %24 = vector.extract_strided_slice %18 {offsets = [1, 0], sizes = [1, 128], strides = [1, 1]} : vector<9x128xf32> to vector<1x128xf32>
    %25 = vector.broadcast %24 : vector<1x128xf32> to vector<16x128xf32>
    %26 = arith.mulf %23, %25 : vector<16x128xf32>
    %c7_i32 = arith.constant 7 : i32
    %27 = tpu.dynamic_rotate %15 by %c7_i32 dim 1 : vector<16x128xf32>, i32 -> vector<16x128xf32>
    %28 = vector.extract_strided_slice %18 {offsets = [2, 0], sizes = [1, 128], strides = [1, 1]} : vector<9x128xf32> to vector<1x128xf32>
    %29 = vector.broadcast %28 : vector<1x128xf32> to vector<16x128xf32>
    %30 = arith.mulf %27, %29 : vector<16x128xf32>
    %c1_i32 = arith.constant 1 : i32
    %31 = tpu.dynamic_rotate %15 by %c1_i32 dim 1 : vector<16x128xf32>, i32 -> vector<16x128xf32>
    %32 = vector.extract_strided_slice %18 {offsets = [3, 0], sizes = [1, 128], strides = [1, 1]} : vector<9x128xf32> to vector<1x128xf32>
    %33 = vector.broadcast %32 : vector<1x128xf32> to vector<16x128xf32>
    %34 = arith.mulf %31, %33 : vector<16x128xf32>
    %c127_i32 = arith.constant 127 : i32
    %35 = tpu.dynamic_rotate %15 by %c127_i32 dim 1 : vector<16x128xf32>, i32 -> vector<16x128xf32>
    %36 = vector.extract_strided_slice %18 {offsets = [5, 0], sizes = [1, 128], strides = [1, 1]} : vector<9x128xf32> to vector<1x128xf32>
    %37 = vector.broadcast %36 : vector<1x128xf32> to vector<16x128xf32>
    %38 = arith.mulf %35, %37 : vector<16x128xf32>
    %c121_i32 = arith.constant 121 : i32
    %39 = tpu.dynamic_rotate %15 by %c121_i32 dim 1 : vector<16x128xf32>, i32 -> vector<16x128xf32>
    %40 = vector.extract_strided_slice %18 {offsets = [6, 0], sizes = [1, 128], strides = [1, 1]} : vector<9x128xf32> to vector<1x128xf32>
    %41 = vector.broadcast %40 : vector<1x128xf32> to vector<16x128xf32>
    %42 = arith.mulf %39, %41 : vector<16x128xf32>
    %c120_i32 = arith.constant 120 : i32
    %43 = tpu.dynamic_rotate %15 by %c120_i32 dim 1 : vector<16x128xf32>, i32 -> vector<16x128xf32>
    %44 = vector.extract_strided_slice %18 {offsets = [7, 0], sizes = [1, 128], strides = [1, 1]} : vector<9x128xf32> to vector<1x128xf32>
    %45 = vector.broadcast %44 : vector<1x128xf32> to vector<16x128xf32>
    %46 = arith.mulf %43, %45 : vector<16x128xf32>
    %c119_i32 = arith.constant 119 : i32
    %47 = tpu.dynamic_rotate %15 by %c119_i32 dim 1 : vector<16x128xf32>, i32 -> vector<16x128xf32>
    %48 = vector.extract_strided_slice %18 {offsets = [8, 0], sizes = [1, 128], strides = [1, 1]} : vector<9x128xf32> to vector<1x128xf32>
    %49 = vector.broadcast %48 : vector<1x128xf32> to vector<16x128xf32>
    %50 = arith.mulf %47, %49 : vector<16x128xf32>
    %51 = tpu.concatenate %22, %26, %30, %34, %15, %38, %42, %46, %50 in 0 : vector<16x128xf32>, vector<16x128xf32>, vector<16x128xf32>, vector<16x128xf32>, vector<16x128xf32>, vector<16x128xf32>, vector<16x128xf32>, vector<16x128xf32>, vector<16x128xf32> -> vector<144x128xf32>
    %cst_20 = arith.constant dense<0.000000e+00> : vector<8x128xf32>
    %52 = tpu.matmul %16, %51, %cst_20 {dimension_numbers = #tpu.dot_dimension_numbers<[1], [0], [0], [1], [0, 0, 1, 1], [], []>} : vector<8x144xf32>, vector<144x128xf32>, vector<8x128xf32> -> vector<8x128xf32>
    %53 = vector.broadcast %17 : vector<8x1xf32> to vector<8x128xf32>
    %54 = arith.addf %52, %53 : vector<8x128xf32>
    %cst_21 = arith.constant 0.000000e+00 : f32
    %55 = vector.broadcast %cst_21 : f32 to vector<8x128xf32>
    %56 = arith.maximumf %54, %55 : vector<8x128xf32>
    %c0_22 = arith.constant 0 : index
    %c0_23 = arith.constant 0 : index
    %57 = vector.load %arg10[%c0_22, %c0_23] : memref<128x256xf32, #tpu.memory_space<vmem>>, vector<128x256xf32>
    %cst_24 = arith.constant dense<0.000000e+00> : vector<8x256xf32>
    %58 = tpu.matmul %56, %57, %cst_24 {dimension_numbers = #tpu.dot_dimension_numbers<[1], [0], [0], [1], [0, 0, 1, 1], [], []>} : vector<8x128xf32>, vector<128x256xf32>, vector<8x256xf32> -> vector<8x256xf32>
    %c0_25 = arith.constant 0 : index
    %c0_26 = arith.constant 0 : index
    %59 = vector.load %arg11[%c0_25, %c0_26] : memref<4x72xf32, #tpu.memory_space<vmem>>, vector<4x72xf32>
    %c0_27 = arith.constant 0 : index
    %c0_28 = arith.constant 0 : index
    %60 = vector.load %arg12[%c0_27, %c0_28] : memref<4x1xf32, #tpu.memory_space<vmem>>, vector<4x1xf32>
    %c0_29 = arith.constant 0 : index
    %c0_30 = arith.constant 0 : index
    %61 = vector.load %arg13[%c0_29, %c0_30] : memref<9x256xf32, #tpu.memory_space<vmem>>, vector<9x256xf32>
    %c17_i32 = arith.constant 17 : i32
    %62 = tpu.dynamic_rotate %58 by %c17_i32 dim 1 : vector<8x256xf32>, i32 -> vector<8x256xf32>
    %63 = vector.extract_strided_slice %61 {offsets = [0, 0], sizes = [1, 256], strides = [1, 1]} : vector<9x256xf32> to vector<1x256xf32>
    %64 = vector.broadcast %63 : vector<1x256xf32> to vector<8x256xf32>
    %65 = arith.mulf %62, %64 : vector<8x256xf32>
    %c16_i32 = arith.constant 16 : i32
    %66 = tpu.dynamic_rotate %58 by %c16_i32 dim 1 : vector<8x256xf32>, i32 -> vector<8x256xf32>
    %67 = vector.extract_strided_slice %61 {offsets = [1, 0], sizes = [1, 256], strides = [1, 1]} : vector<9x256xf32> to vector<1x256xf32>
    %68 = vector.broadcast %67 : vector<1x256xf32> to vector<8x256xf32>
    %69 = arith.mulf %66, %68 : vector<8x256xf32>
    %c15_i32 = arith.constant 15 : i32
    %70 = tpu.dynamic_rotate %58 by %c15_i32 dim 1 : vector<8x256xf32>, i32 -> vector<8x256xf32>
    %71 = vector.extract_strided_slice %61 {offsets = [2, 0], sizes = [1, 256], strides = [1, 1]} : vector<9x256xf32> to vector<1x256xf32>
    %72 = vector.broadcast %71 : vector<1x256xf32> to vector<8x256xf32>
    %73 = arith.mulf %70, %72 : vector<8x256xf32>
    %c1_i32_31 = arith.constant 1 : i32
    %74 = tpu.dynamic_rotate %58 by %c1_i32_31 dim 1 : vector<8x256xf32>, i32 -> vector<8x256xf32>
    %75 = vector.extract_strided_slice %61 {offsets = [3, 0], sizes = [1, 256], strides = [1, 1]} : vector<9x256xf32> to vector<1x256xf32>
    %76 = vector.broadcast %75 : vector<1x256xf32> to vector<8x256xf32>
    %77 = arith.mulf %74, %76 : vector<8x256xf32>
    %c255_i32 = arith.constant 255 : i32
    %78 = tpu.dynamic_rotate %58 by %c255_i32 dim 1 : vector<8x256xf32>, i32 -> vector<8x256xf32>
    %79 = vector.extract_strided_slice %61 {offsets = [5, 0], sizes = [1, 256], strides = [1, 1]} : vector<9x256xf32> to vector<1x256xf32>
    %80 = vector.broadcast %79 : vector<1x256xf32> to vector<8x256xf32>
    %81 = arith.mulf %78, %80 : vector<8x256xf32>
    %c241_i32 = arith.constant 241 : i32
    %82 = tpu.dynamic_rotate %58 by %c241_i32 dim 1 : vector<8x256xf32>, i32 -> vector<8x256xf32>
    %83 = vector.extract_strided_slice %61 {offsets = [6, 0], sizes = [1, 256], strides = [1, 1]} : vector<9x256xf32> to vector<1x256xf32>
    %84 = vector.broadcast %83 : vector<1x256xf32> to vector<8x256xf32>
    %85 = arith.mulf %82, %84 : vector<8x256xf32>
    %c240_i32 = arith.constant 240 : i32
    %86 = tpu.dynamic_rotate %58 by %c240_i32 dim 1 : vector<8x256xf32>, i32 -> vector<8x256xf32>
    %87 = vector.extract_strided_slice %61 {offsets = [7, 0], sizes = [1, 256], strides = [1, 1]} : vector<9x256xf32> to vector<1x256xf32>
    %88 = vector.broadcast %87 : vector<1x256xf32> to vector<8x256xf32>
    %89 = arith.mulf %86, %88 : vector<8x256xf32>
    %c239_i32 = arith.constant 239 : i32
    %90 = tpu.dynamic_rotate %58 by %c239_i32 dim 1 : vector<8x256xf32>, i32 -> vector<8x256xf32>
    %91 = vector.extract_strided_slice %61 {offsets = [8, 0], sizes = [1, 256], strides = [1, 1]} : vector<9x256xf32> to vector<1x256xf32>
    %92 = vector.broadcast %91 : vector<1x256xf32> to vector<8x256xf32>
    %93 = arith.mulf %90, %92 : vector<8x256xf32>
    %94 = tpu.concatenate %65, %69, %73, %77, %58, %81, %85, %89, %93 in 0 : vector<8x256xf32>, vector<8x256xf32>, vector<8x256xf32>, vector<8x256xf32>, vector<8x256xf32>, vector<8x256xf32>, vector<8x256xf32>, vector<8x256xf32>, vector<8x256xf32> -> vector<72x256xf32>
    %cst_32 = arith.constant dense<0.000000e+00> : vector<4x256xf32>
    %95 = tpu.matmul %59, %94, %cst_32 {dimension_numbers = #tpu.dot_dimension_numbers<[1], [0], [0], [1], [0, 0, 1, 1], [], []>} : vector<4x72xf32>, vector<72x256xf32>, vector<4x256xf32> -> vector<4x256xf32>
    %96 = vector.broadcast %60 : vector<4x1xf32> to vector<4x256xf32>
    %97 = arith.addf %95, %96 : vector<4x256xf32>
    %98 = math.tanh %97 : vector<4x256xf32>
    %c0_33 = arith.constant 0 : index
    %c0_34 = arith.constant 0 : index
    %c0_35 = arith.constant 0 : index
    %99 = vector.load %arg14[%c0_33, %c0_34, %c0_35] : memref<1x4x256xf32, #tpu.memory_space<vmem>>, vector<1x4x256xf32>
    %100 = vector.shape_cast %99 : vector<1x4x256xf32> to vector<4x256xf32>
    %101 = vector.shape_cast %98 : vector<4x256xf32> to vector<1x4x256xf32>
    tpu.vector_store %arg14[%c0_33, %c0_34, %c0_35], %101 {strides = array<i32>} : memref<1x4x256xf32, #tpu.memory_space<vmem>>, vector<1x4x256xf32>,
    return
  }
  func.func @transform_0(%arg0: i32) -> (i32, i32) {
    %c0_i32 = arith.constant 0 : i32
    %c0_i32_0 = arith.constant 0 : i32
    %c0_i32_1 = arith.constant 0 : i32
    return %c0_i32, %c0_i32_0 : i32, i32
  }
  func.func @transform_1(%arg0: i32) -> (i32, i32, i32) {
    %c0_i32 = arith.constant 0 : i32
    %c0_i32_0 = arith.constant 0 : i32
    %c0_i32_1 = arith.constant 0 : i32
    return %arg0, %c0_i32, %c0_i32_0 : i32, i32, i32
  }
  func.func @transform_2(%arg0: i32) -> (i32, i32) {
    %c0_i32 = arith.constant 0 : i32
    %c0_i32_0 = arith.constant 0 : i32
    %c0_i32_1 = arith.constant 0 : i32
    return %c0_i32, %c0_i32_0 : i32, i32
  }
  func.func @transform_3(%arg0: i32) -> (i32, i32) {
    %c0_i32 = arith.constant 0 : i32
    %c0_i32_0 = arith.constant 0 : i32
    %c0_i32_1 = arith.constant 0 : i32
    return %c0_i32, %c0_i32_0 : i32, i32
  }
  func.func @transform_4(%arg0: i32) -> (i32, i32) {
    %c0_i32 = arith.constant 0 : i32
    %c0_i32_0 = arith.constant 0 : i32
    %c0_i32_1 = arith.constant 0 : i32
    return %c0_i32, %c0_i32_0 : i32, i32
  }
  func.func @transform_5(%arg0: i32) -> (i32, i32) {
    %c0_i32 = arith.constant 0 : i32
    %c0_i32_0 = arith.constant 0 : i32
    %c0_i32_1 = arith.constant 0 : i32
    return %c0_i32, %c0_i32_0 : i32, i32
  }
  func.func @transform_6(%arg0: i32) -> (i32, i32) {
    %c0_i32 = arith.constant 0 : i32
    %c0_i32_0 = arith.constant 0 : i32
    %c0_i32_1 = arith.constant 0 : i32
    return %c0_i32, %c0_i32_0 : i32, i32
  }
  func.func @transform_7(%arg0: i32) -> (i32, i32) {
    %c0_i32 = arith.constant 0 : i32
    %c0_i32_0 = arith.constant 0 : i32
    %c0_i32_1 = arith.constant 0 : i32
    return %c0_i32, %c0_i32_0 : i32, i32
  }
  func.func @transform_8(%arg0: i32) -> (i32, i32) {
    %c0_i32 = arith.constant 0 : i32
    %c0_i32_0 = arith.constant 0 : i32
    %c0_i32_1 = arith.constant 0 : i32
    return %c0_i32, %c0_i32_0 : i32, i32
  }
  func.func @transform_9(%arg0: i32) -> (i32, i32) {
    %c0_i32 = arith.constant 0 : i32
    %c0_i32_0 = arith.constant 0 : i32
    %c0_i32_1 = arith.constant 0 : i32
    return %c0_i32, %c0_i32_0 : i32, i32
  }
  func.func @transform_10(%arg0: i32) -> (i32, i32) {
    %c0_i32 = arith.constant 0 : i32
    %c0_i32_0 = arith.constant 0 : i32
    %c0_i32_1 = arith.constant 0 : i32
    return %c0_i32, %c0_i32_0 : i32, i32
  }
  func.func @transform_11(%arg0: i32) -> (i32, i32) {
    %c0_i32 = arith.constant 0 : i32
    %c0_i32_0 = arith.constant 0 : i32
    %c0_i32_1 = arith.constant 0 : i32
    return %c0_i32, %c0_i32_0 : i32, i32
  }
  func.func @transform_12(%arg0: i32) -> (i32, i32) {
    %c0_i32 = arith.constant 0 : i32
    %c0_i32_0 = arith.constant 0 : i32
    %c0_i32_1 = arith.constant 0 : i32
    return %c0_i32, %c0_i32_0 : i32, i32
  }
  func.func @transform_13(%arg0: i32) -> (i32, i32, i32) {
    %c0_i32 = arith.constant 0 : i32
    %c0_i32_0 = arith.constant 0 : i32
    %c0_i32_1 = arith.constant 0 : i32
    return %arg0, %c0_i32, %c0_i32_0 : i32, i32, i32
  }
}

</mosaic_0001>

<bundles_post_ra>
// kernel: tpu_custom_call.1
= control target key start
LH: loop header
LB: loop body
LE: loop exit
PB: predicated region body
PF: predicated region fallthrough
CT: control target
= control target key end

     0   :  { %s2438_s0 = inlined_call_operand.<no memory space> [shape: f32[1,1], index: 0, kind: input, shape index: {}]   ;;  %s2439_s1 = inlined_call_operand.hbm [shape: f32[2,1,32], index: 1, kind: input, shape index: {}]   ;;  %s2440_s2 = inlined_call_operand.hbm [shape: f32[32,256], index: 2, kind: input, shape index: {}]   ;;  %s2441_s3 = inlined_call_operand.hbm [shape: f32[1,256], index: 3, kind: input, shape index: {}]   ;;  %s2442_s4 = inlined_call_operand.hbm [shape: f32[16,256], index: 4, kind: input, shape index: {}]   ;;  %s2443_s5 = inlined_call_operand.hbm [shape: f32[256,128], index: 5, kind: input, shape index: {}]   ;;  %s2444_s6 = inlined_call_operand.hbm [shape: f32[8,144], index: 6, kind: input, shape index: {}]   ;;  %s2445_s7 = inlined_call_operand.vmem [shape: f32[8,1], index: 7, kind: input, shape index: {}]   ;;  %s2446_s8 = inlined_call_operand.hbm [shape: f32[9,128], index: 8, kind: input, shape index: {}]   ;;  %s2447_s9 = inlined_call_operand.hbm [shape: f32[128,256], index: 9, kind: input, shape index: {}]   ;;  %s2448_s10 = inlined_call_operand.vmem [shape: f32[4,72], index: 10, kind: input, shape index: {}]   ;;  %s2449_s11 = inlined_call_operand.vmem [shape: f32[4,1], index: 11, kind: input, shape index: {}]   ;;  %s2450_s12 = inlined_call_operand.vmem [shape: f32[9,256], index: 12, kind: input, shape index: {}]   ;;  %s2451_s13 = inlined_call_operand.hbm [shape: f32[2,4,256], index: 13, kind: output, shape index: {}]  }
   0x1   :  { %2458 = sst [smem:[#allocation24_spill]] %s2440_s2 }
   0x2   :  { %2459 = sst [smem:[#allocation25_spill]] %s2441_s3 }
   0x3   :  { %2460 = sst [smem:[#allocation26_spill]] %s2442_s4 }
   0x4   :  { %2461 = sst [smem:[#allocation27_spill]] %s2443_s5 }
   0x5   :  { %2462 = sst [smem:[#allocation28_spill]] %s2444_s6 }
   0x6   :  { %2463 = sst [smem:[#allocation29_spill]] %s2446_s8 }
   0x7   :  { %2464 = sst [smem:[#allocation30_spill]] %s2447_s9 }
   0x8   :  { %18 = sst [smem:[#allocation2]] %s2438_s0 }
   0x9   :  { %19 = vsyncpa [#allocation4], 0 }
   0xa   :  { %21 = vsyncpa [#allocation4 + $0x1], 0 }
   0xb   :  { %22 = vsyncpa [#allocation7], 0 }
   0xc   :  { %23 = vsyncpa [#allocation10], 0 }
   0xd   :  { %24 = vsyncpa [#allocation13], 0 }
   0xe   :  { %25 = vsyncpa [#allocation16], 0 }
   0xf   :  { %26 = vsyncpa [#allocation5], 0 }
  0x10   :  { %28 = vsyncpa [#allocation5 + $0x1], 0  ;;  %s2030_s27 = smov 0   ;;  %s2032_s28 = smov 0  }
  0x11   :  { %s2034_s29 = smov 0   ;;  %s2036_s30 = smov 0  }
  0x12 LB: > { %s1928_s0 = smov [#allocation6]   ;;  %s2051_s15 = sadd.s32 4294967295, %s1926_s30   ;;  %s1926_s30 = sphi %s2036_s30, %s2498_s30   ;;  %s1922_s29 = sphi %s2034_s29, %s2497_s29   ;;  %s1918_s28 = sphi %s2032_s28, %s2496_s28   ;;  %s1914_s27 = sphi %s2030_s27, %s2495_s27  }
  0x13   : > { %s358_s14 = sshll.u32 %s1928_s0, 4  ;;  %p1425_p0 = scmp.ge.s32.totalorder %s1926_s30, 1  ;;  %s359_s14 = int_to_ptr.vmem [resolvable:$true] %s358_s14 }
  0x14   : > { %p2453_p1 = scmp.eq.s32.totalorder %s2051_s15, 0  ;;  %p343_p2 = scmp.lt.s32.totalorder %s1926_s30, 3 }
  0x15   : > { %s1929_s17 = smov [#allocation9]   ;;  %s1930_s20 = smov [#allocation12]  }
  0x16   : > { %p2056_p3 = pnand %p1425_p0, %p343_p2  ;;  %s382_s18 = sshll.u32 %s1929_s17, 4  ;;  %s2069_s18 = int_to_ptr.vmem [resolvable:$true] %s382_s18 }
  0x17   : > { %s409_s21 = sshll.u32 %s1930_s20, 4  ;;  %s1647_s23 = scalar_lea.vmem %s359_s14, 1024  ;;  %s2071_s21 = int_to_ptr.vmem [resolvable:$true] %s409_s21 }
  0x18   : > { %s2465_s16 = scalar_select %p2056_p3, 1, 0 }
  0x19   : > { %p1526_p5 = pneg %p2056_p3  ;;  %p1648_p8 = scmp.ne.s32.totalorder %s359_s14, %s1647_s23 }
  0x1a   : > { %p1655_p11 = scmp.lt.s32.totalorder %s359_s14, %s359_s14  ;;  %p1656_p12 = scmp.lt.s32.totalorder %s1647_s23, %s1647_s23 }
  0x1b   : > { %p2065_p6 = pnand %p1526_p5, %p2453_p1 }
  0x1c   : > { %p1657_p13 = por %p1656_p12, %p1655_p11 }
  0x1d   : > { %p2075_p7 = pneg %p2065_p6 }
  0x1f   : > { %p1650_p9 = pnand %p1648_p8, %p2075_p7 }
  0x21   : > { %p1651_p10 = pneg %p1650_p9 }
  0x23   : > { %p1658_p0 = pnand %p1657_p13, %p1651_p10 }
  0x25   : > { %1661 = shalt.err (!%p1658_p0)
}
  0x26   : > { %s2452_s24 = smov 256   ;;  %s2455_s25 = smov 16  }
  0x27   : > { %s2468_s2 = sld [smem:[#allocation24_spill]]  ;;  %s1673_s17 = scalar_lea.vmem %s2069_s18, 512 }
  0x28   : > { %p1674_p2 = scmp.ne.s32.totalorder %s2069_s18, %s1673_s17  ;;  %p1681_p9 = scmp.lt.s32.totalorder %s2069_s18, %s2069_s18 }
  0x29   : > { %p1682_p10 = scmp.lt.s32.totalorder %s1673_s17, %s1673_s17 }
  0x2a   : > { %p1676_p5 = pnand %p1674_p2, %p2075_p7 }
  0x2b   : > { %p1683_p11 = por %p1682_p10, %p1681_p9 }
  0x2c   : > { %p1677_p8 = pneg %p1676_p5 }
  0x2d   : > { %1529 = dma.hbm_to_vmem [thread:$0]  (!%p2065_p6), %s2468_s2, 1024, %s359_s14, [#allocation7], %s2452_s24, %s2452_s24, %s2455_s25  }
  0x2e   : > { %p1684_p12 = pnand %p1683_p11, %p1677_p8 }
  0x30   : > { %1687 = shalt.err (!%p1684_p12)
}
  0x31   : > { %s2469_s4 = sld [smem:[#allocation26_spill]]  ;;  %s1699_s14 = scalar_lea.vmem %s2071_s21, 256 }
  0x32   : > { %p1700_p13 = scmp.ne.s32.totalorder %s2071_s21, %s1699_s14  ;;  %p1707_p5 = scmp.lt.s32.totalorder %s2071_s21, %s2071_s21 }
  0x33   : > { %p1708_p8 = scmp.lt.s32.totalorder %s1699_s14, %s1699_s14 }
  0x34   : > { %p1702_p0 = pnand %p1700_p13, %p2075_p7 }
  0x35   : > { %p1709_p9 = por %p1708_p8, %p1707_p5 }
  0x36   : > { %p1703_p2 = pneg %p1702_p0 }
  0x37   : > { %1535 = dma.hbm_to_vmem [thread:$0]  (!%p2065_p6), %s2469_s4, 512, %s2069_s18, [#allocation10], %s2452_s24, %s2452_s24, %s2455_s25  }
  0x38   : > { %p1710_p10 = pnand %p1709_p9, %p1703_p2 }
  0x3a   : > { %1713 = shalt.err (!%p1710_p10)
}
  0x3b   : > { %s2470_s6 = sld [smem:[#allocation28_spill]]  ;;  %s1933_s18 = smov [#allocation8]  }
  0x3c   : > { %s372_s17 = sshll.u32 %s1933_s18, 4  ;;  %s1934_s20 = smov [#allocation11]   ;;  %s373_s17 = int_to_ptr.vmem [resolvable:$true] %s372_s17 }
  0x3d   : > { %s395_s23 = sshll.u32 %s1934_s20, 4  ;;  %s1725_s24 = scalar_lea.vmem %s373_s17, 32  ;;  %s396_s23 = int_to_ptr.vmem [resolvable:$true] %s395_s23 }
  0x3e   : > { %p1726_p11 = scmp.ne.s32.totalorder %s373_s17, %s1725_s24  ;;  %p1733_p0 = scmp.lt.s32.totalorder %s373_s17, %s373_s17 }
  0x3f   : > { %p1734_p2 = scmp.lt.s32.totalorder %s1725_s24, %s1725_s24 }
  0x40   : > { %p1728_p12 = pnand %p1726_p11, %p2075_p7 }
  0x41   : > { %1541 = dma.hbm_to_vmem [thread:$0]  (!%p2065_p6), %s2470_s6, 256, %s2071_s21, [#allocation13]  }
  0x42   : > { %p1729_p13 = pneg %p1728_p12  ;;  %p1735_p5 = por %p1734_p2, %p1733_p0 }
  0x44   : > { %p1736_p8 = pnand %p1735_p5, %p1729_p13 }
  0x46   : > { %1739 = shalt.err (!%p1736_p8)
}
  0x47   : > { %s2471_s3 = sld [smem:[#allocation25_spill]]  ;;  %s1751_s21 = scalar_lea.vmem %s396_s23, 4096 }
  0x48   : > { %p1752_p9 = scmp.ne.s32.totalorder %s396_s23, %s1751_s21  ;;  %p1759_p11 = scmp.lt.s32.totalorder %s396_s23, %s396_s23 }
  0x49   : > { %p1760_p12 = scmp.lt.s32.totalorder %s1751_s21, %s1751_s21 }
  0x4a   : > { %p1754_p10 = pnand %p1752_p9, %p2075_p7 }
  0x4b   : > { %p1761_p1 = por %p1760_p12, %p1759_p11 }
  0x4c   : > { %p1755_p4 = pneg %p1754_p10 }
  0x4d   : > { %1532 = dma.hbm_to_vmem [thread:$0]  (!%p2065_p6), %s2471_s3, 32, %s373_s17, [#allocation7]  }
  0x4e   : > { %p1762_p3 = pnand %p1761_p1, %p1755_p4 }
  0x50   : > { %1765 = shalt.err (!%p1762_p3)
}
  0x51   : > { %s1935_s24 = smov 128   ;;  %s1936_s0 = smov 8  }
  0x52   : > { %s2472_s5 = sld [smem:[#allocation27_spill]]  ;;  %s1937_s17 = smov [#allocation14]  }
  0x53   : > { %s422_s14 = sshll.u32 %s1937_s17, 4  ;;  %s1938_s26 = smov [#allocation15]   ;;  %s423_s14 = int_to_ptr.vmem [resolvable:$true] %s422_s14 }
  0x54   : > { %s435_s25 = sshll.u32 %s1938_s26, 4  ;;  %s1777_s2 = scalar_lea.vmem %s423_s14, 256  ;;  %s436_s25 = int_to_ptr.vmem [resolvable:$true] %s435_s25 }
  0x55   : > { %p1778_p13 = scmp.ne.s32.totalorder %s423_s14, %s1777_s2  ;;  %p1785_p3 = scmp.lt.s32.totalorder %s423_s14, %s423_s14 }
  0x56   : > { %p1786_p4 = scmp.lt.s32.totalorder %s1777_s2, %s1777_s2 }
  0x57   : > { %p1780_p0 = pnand %p1778_p13, %p2075_p7 }
  0x58   : > { %1538 = dma.hbm_to_vmem [thread:$0]  (!%p2065_p6), %s2472_s5, 4096, %s396_s23, [#allocation10], %s1935_s24, %s1935_s24, %s1936_s0  }
  0x59   : > { %p1781_p1 = pneg %p1780_p0  ;;  %p1787_p2 = por %p1786_p4, %p1785_p3 }
  0x5b   : > { %p1788_p5 = pnand %p1787_p2, %p1781_p1 }
  0x5d   : > { %1791 = shalt.err (!%p1788_p5)
}
  0x5e   : > { %s2473_s8 = sld [smem:[#allocation29_spill]]  ;;  %s1803_s23 = scalar_lea.vmem %s436_s25, 4096 }
  0x5f   : > { %p1804_p8 = scmp.ne.s32.totalorder %s436_s25, %s1803_s23  ;;  %p1811_p11 = scmp.lt.s32.totalorder %s436_s25, %s436_s25 }
  0x60   : > { %p1812_p12 = scmp.lt.s32.totalorder %s1803_s23, %s1803_s23 }
  0x61   : > { %p1806_p9 = pnand %p1804_p8, %p2075_p7 }
  0x62   : > { %p1813_p13 = por %p1812_p12, %p1811_p11 }
  0x63   : > { %p1807_p10 = pneg %p1806_p9 }
  0x64   : > { %1544 = dma.hbm_to_vmem [thread:$0]  (!%p2065_p6), %s2473_s8, 256, %s423_s14, [#allocation13], %s1935_s24, %s1935_s24, %s1936_s0  }
  0x65   : > { %p1814_p0 = pnand %p1813_p13, %p1807_p10 }
  0x67   : > { %1817 = shalt.err (!%p1814_p0)
}
  0x68   : > { %s2474_s2 = smov 16   ;;  %s2475_s20 = smov 256  }
  0x69   : > { %s2476_s9 = sld [smem:[#allocation30_spill]]  ;;  %s1424_s19 = sadd.s32 4294967294, %s1926_s30  }
  0x6a   : > { %s2149_s22 = sadd.s32 1, %s1926_s30   ;;  %s62_s24 = sadd.s32 1, %s1922_s29 }
  0x6b   : > { %s59_s0 = ssub.s32 %s1926_s30, %s2149_s22  ;;  %p69_p7 = scmp.ne.s32.totalorder %s1922_s29, %s1918_s28 }
  0x6c   : > { %p60_p1 = scmp.eq.s32.totalorder %s59_s0, 0  ;;  %p70_p3 = scmp.eq.s32.totalorder %s1926_s30, 0 }
  0x6d   : > { %p75_p4 = scmp.ne.s32.totalorder %s1918_s28, %s1914_s27  ;;  %p330_p2 = scmp.eq.s32.totalorder %s2051_s15, 1 }
  0x6e   : > { %s2161_s14 = scalar_select %p60_p1, %s1922_s29, %s62_s24  }
  0x6f   : > { %1547 = dma.hbm_to_vmem [thread:$0]  (!%p2065_p6), %s2476_s9, 4096, %s436_s25, [#allocation16], %s2475_s20, %s2475_s20, %s2474_s2  }
  0x70   : > { %p71_p5 = por %p70_p3, %p69_p7  ;;  %p2477_p8 = scmp.eq.s32.totalorder %s2051_s15, 0 }
  0x71   : > { %p2169_p6 = por %p330_p2, %p69_p7  ;;  %p336_p10 = scmp.eq.s32.totalorder %s1424_s19, 1 }
  0x72   : > { %p2165_p9 = por %p2477_p8, %p75_p4  ;;  %p1563_p11 = scmp.lt.s32.totalorder %s1926_s30, 2 }
  0x73   : > { %s2479_s25 = scalar_select %p2169_p6, 1, 0 }
  0x74   : > { %s2478_s21 = scalar_select %p2165_p9, 1, 0 }
  0x75   : > { %s458_s18 = sand.u32 1, %s1922_s29   ;;  %p2175_p12 = por %p336_p10, %p75_p4 }
  0x76   : > { %s1434_s2 = sshll.u32 %s1926_s30, 4  ;;  %s461_s24 = scalar_lea.vmem [#allocation3], %s458_s18 }
  0x77   : > { %s2480_s23 = scalar_select %p2175_p12, 1, 0 }
  0x78   : > { %s2183_s26 = scalar_lea.hbm %s2439_s1, %s1434_s2  ;;  %s468_s0 = sshll.u32 %s461_s24, 4  ;;  %s469_s0 = int_to_ptr.vmem [resolvable:$true] %s468_s0 }
  0x79   : > { %p2185_p13 = pnand %p1563_p11, %p71_p5  ;;  %s459_s3 = scalar_lea.sflag [#allocation4], %s458_s18 }
  0x7a   : > { %s1818_s4 = scalar_lea.hbm %s2183_s26, 16  ;;  %s1823_s17 = scalar_lea.hbm %s2439_s1, 32 }
  0x7b   : > { %p1819_p0 = scmp.ne.s32.totalorder %s2183_s26, %s1818_s4  ;;  %p1820_p7 = pneg %p2185_p13 }
  0x7c   : > { %p1824_p4 = scmp.lt.s32.totalorder %s2183_s26, %s2439_s1  ;;  %p1825_p2 = scmp.lt.s32.totalorder %s1823_s17, %s1818_s4 }
  0x7d   : > { %p1821_p1 = pnand %p1820_p7, %p1819_p0 }
  0x7e   : > { %p1826_p5 = por %p1825_p2, %p1824_p4 }
  0x7f   : > { %p1822_p3 = pneg %p1821_p1 }
  0x81   : > { %p1827_p8 = pnand %p1826_p5, %p1822_p3 }
  0x83   : > { %1830 = shalt.err (!%p1827_p8)
}
  0x84   : > { %s1831_s24 = scalar_lea.vmem %s469_s0, 16  ;;  %s1939_s18 = smov [#allocation3]  }
  0x85   : > { %p1832_p10 = scmp.ne.s32.totalorder %s469_s0, %s1831_s24  ;;  %s1836_s8 = sshll.u32 %s1939_s18, 4  ;;  %s1837_s8 = int_to_ptr.vmem [resolvable:$false] %s1836_s8 }
  0x86   : > { %s1838_s9 = scalar_lea.vmem %s1837_s8, 32  ;;  %p1839_p0 = scmp.lt.s32.totalorder %s469_s0, %s1837_s8 }
  0x87   : > { %p1834_p11 = pnand %p1832_p10, %p1820_p7  ;;  %p1840_p1 = scmp.lt.s32.totalorder %s1838_s9, %s1831_s24 }
  0x89   : > { %p1835_p12 = pneg %p1834_p11  ;;  %p1841_p6 = por %p1840_p1, %p1839_p0 }
  0x8b   : > { %p1842_p9 = pnand %p1841_p6, %p1835_p12 }
  0x8d   : > { %1845 = shalt.err (!%p1842_p9)
}
  0x8e   : > { %1551 = dma.hbm_to_vmem [thread:$0]  (!%p2185_p13), %s2183_s26, 16, %s469_s0, %s459_s3  }
  0x8f   : > { %p2482_p3 = scmp.ne.s32.totalorder %s2465_s16, 0 }
  0x90   : > { %s2206_s4 = sand.u32 (!%p2482_p3), 1, %s1918_s28   ;;  %p2483_p7 = scmp.ne.s32.totalorder (!%p2482_p3), %s2478_s21, 0 }
  0x91   : > { %477 = sbr.rel (%p2482_p3) target bundleno = 1501 (0x5dd), region = 72  ;;  %s480_s5 = scalar_lea.sflag (!%p2482_p3), [#allocation4], %s2206_s4 }
  0x92   : > { %s482_s6 = scalar_lea.vmem (!%p2482_p3), [#allocation3], %s2206_s4 }
  0x96   : > { %1889 = dma.done.wait (%p2483_p7), %s480_s5, 16  }
  0x97   : > { %1891 = vsyncadd (%p2483_p7), %s480_s5, 4294967280  ;;  %p2484_p9 = scmp.eq.s32.totalorder %s2051_s15, 0 }
  0x99   : > { %1893 = dma.done.wait (%p2484_p9), [#allocation7], 1056   ;;  %p2485_p6 = pmov %p2484_p9 }
  0x9b   : > { %1895 = vsyncadd (%p2485_p6), [#allocation7], 4294966240  ;;  %p2486_p12 = pmov %p2485_p6 }
  0x9c   : > { %p2487_p13 = pmov %p2485_p6 }
  0x9d   : > { %1897 = dma.done.wait (%p2486_p12), [#allocation10], 4608  }
  0x9e   : > { %1899 = vsyncadd (%p2487_p13), [#allocation10], 4294962688  ;;  %p2488_p4 = pmov %p2485_p6 }
  0xa0   : > { %1901 = dma.done.wait (%p2488_p4), [#allocation13], 512   ;;  %p2489_p2 = pmov %p2488_p4 }
  0xa2   : > { %1903 = vsyncadd (%p2489_p2), [#allocation13], 4294966784  ;;  %p2490_p5 = pmov %p2489_p2 }
  0xa3   : > { %p2491_p8 = pmov %p2489_p2 }
  0xa4   : > { %1905 = dma.done.wait (%p2490_p5), [#allocation16], 4096  }
  0xa5   : > { %1907 = vsyncadd (%p2491_p8), [#allocation16], 4294963200  ;;  %v1940_v0 = vmov 0.0   ;;  %s553_s3 = sld [smem:[#allocation2]]  ;;  %v563_v1 = vld [vmem:[#allocation6 + $0x38] sm:$0xff]  ;;  %v562_v2 = vld [vmem:[#allocation6 + $0x30] sm:$0xff]  ;;  %v566_v44 = vlaneseq }
  0xa6   : > { %644 = vmatprep.mubr.f32.mxu0 %v1940_v0  ;;  %v561_v3 = vld [vmem:[#allocation6 + $0x28] sm:$0xff]  ;;  %604 = vmatprep.subr.mxu0 %v563_v1  ;;  %v560_v4 = vld [vmem:[#allocation6 + $0x20] sm:$0xff]  ;;  %v559_v5 = vld [vmem:[#allocation6 + $0x18] sm:$0xff]  ;;  %vm576_vm0 = vcmask 261120   ;;  %s1941_s8 = smov 121   ;;  %s1942_s9 = smov 120  }
  0xa7   : > { %605 = vmatpush1.msra.mxu0 %v562_v2  ;;  %v558_v6 = vld [vmem:[#allocation6 + $0x10] sm:$0xff]  ;;  %v552_v7 = vld [vmem:[%s482_s6] sm:$0x1]  ;;  %v557_v12 = vld [vmem:[#allocation6 + $0x8] sm:$0xff]  ;;  %v2233_v45 = vshrl.u32 %v566_v44, 7  ;;  %s1943_s16 = smov 127  }
  0xa8   : > { %606 = vmatprep.subr.mxu0 %v561_v3  ;;  %v700_v9 = vld [vmem:[#allocation11 + $0xf8] sm:$0xff]  ;;  %v699_v11 = vld [vmem:[#allocation11 + $0xf0] sm:$0xff]  ;;  %v698_v16 = vld [vmem:[#allocation11 + $0xe8] sm:$0xff]  ;;  %s1944_s21 = smov 1   ;;  %s1945_s26 = smov 7   ;;  %vm866_vm1 = vcmask 130048  }
  0xa9   : > { %v684_v10 = vld [vmem:[#allocation11 + $0x78] sm:$0xff]  ;;  %607 = vmatpush1.msra.mxu0 %v560_v4  ;;  %1456 = vmatprep.subr.mxu1 %v700_v9  ;;  %v683_v13 = vld [vmem:[#allocation11 + $0x70] sm:$0xff]  ;;  %v682_v17 = vld [vmem:[#allocation11 + $0x68] sm:$0xff]  ;;  %v2236_v46 = vsub.s32 0, %v2233_v45  ;;  %v2239_v48 = vsub.s32 1, %v2233_v45  ;;  %s1946_s0 = smov 8  }
  0xaa   : > { %608 = vmatprep.subr.mxu0 %v559_v5  ;;  %v556_v14 = vld [vmem:[#allocation6] sm:$0xff]  ;;  %1457 = vmatpush3.msra.mxu1 %v684_v10  ;;  %v695_v22 = vld [vmem:[#allocation11 + $0xd0] sm:$0xff]  ;;  %v694_v24 = vld [vmem:[#allocation11 + $0xc8] sm:$0xff]  ;;  %s1947_s19 = smov 9   ;;  %s1949_s2 = smov 119   ;;  %vm1193_vm10 = vcmask 588800  }
  0xab   : > { %v554_v8 = vstv %s553_s3  ;;  %609 = vmatpush1.msra.mxu0 %v558_v6  ;;  %1458 = vmatprep.subr.mxu1 %v699_v11  ;;  %v697_v18 = vld [vmem:[#allocation11 + $0xe0] sm:$0xff]  ;;  %v696_v20 = vld [vmem:[#allocation11 + $0xd8] sm:$0xff]  ;;  %v679_v23 = vld [vmem:[#allocation11 + $0x50] sm:$0xff]  ;;  %s1950_s24 = smov 112   ;;  %s1951_s18 = smov 111  }
  0xac   : > { %v555_v15 = vmul.f32 %v554_v8, %v552_v7  ;;  %610 = vmatprep.subr.mxu0 %v557_v12  ;;  %1459 = vmatpush3.msra.mxu1 %v683_v13  ;;  %v681_v19 = vld [vmem:[#allocation11 + $0x60] sm:$0xff]  ;;  %v680_v21 = vld [vmem:[#allocation11 + $0x58] sm:$0xff]  ;;  %v678_v25 = vld [vmem:[#allocation11 + $0x48] sm:$0xff]  ;;  %v1948_v13 = vmov 0   ;;  %s1952_s5 = smov 113   ;;  %s1953_s6 = smov 15  }
  0xad   : > { %611 = vmatpush1.msra.mxu0 %v556_v14  ;;  %1460 = vmatprep.subr.mxu1 %v698_v16  ;;  %v693_v26 = vld [vmem:[#allocation11 + $0xc0] sm:$0xff]  ;;  %v692_v28 = vld [vmem:[#allocation11 + $0xb8] sm:$0xff]  ;;  %v691_v30 = vld [vmem:[#allocation11 + $0xb0] sm:$0xff]  ;;  %s1954_s3 = smov 16   ;;  %p2492_p11 = scmp.ne.s32.totalorder %s2479_s25, 0 }
  0xae   : > { %1444 = vmatmul.mubr.msk.f32.vlgmr.msra.gmra.mxu0 %vm576_vm0, %v555_v15  ;;  %1461 = vmatpush3.msra.mxu1 %v682_v17  ;;  %v677_v27 = vld [vmem:[#allocation11 + $0x40] sm:$0xff]  ;;  %v676_v29 = vld [vmem:[#allocation11 + $0x38] sm:$0xff]  ;;  %v675_v31 = vld [vmem:[#allocation11 + $0x30] sm:$0xff] }
  0xaf   : > { %1462 = vmatprep.subr.mxu1 %v697_v18  ;;  %870 = vmatprep.subr.mxu0 %v1940_v0  ;;  %v690_v32 = vld [vmem:[#allocation11 + $0xa8] sm:$0xff]  ;;  %v689_v34 = vld [vmem:[#allocation11 + $0xa0] sm:$0xff]  ;;  %v688_v36 = vld [vmem:[#allocation11 + $0x98] sm:$0xff] }
  0xb0   : > { %1463 = vmatpush3.msra.mxu1 %v681_v19  ;;  %v674_v33 = vld [vmem:[#allocation11 + $0x28] sm:$0xff]  ;;  %v673_v35 = vld [vmem:[#allocation11 + $0x20] sm:$0xff]  ;;  %v672_v37 = vld [vmem:[#allocation11 + $0x18] sm:$0xff]  ;;  %1631 = vset.pattern.permute.xlu0 %v1948_v13 }
  0xb1   : > { %1464 = vmatprep.subr.mxu1 %v696_v20  ;;  %v687_v38 = vld [vmem:[#allocation11 + $0x90] sm:$0xff]  ;;  %v686_v40 = vld [vmem:[#allocation11 + $0x88] sm:$0xff]  ;;  %v685_v42 = vld [vmem:[#allocation11 + $0x80] sm:$0xff] }
  0xb2   : > { %1465 = vmatpush3.msra.mxu1 %v680_v21  ;;  %v671_v39 = vld [vmem:[#allocation11 + $0x10] sm:$0xff]  ;;  %v670_v41 = vld [vmem:[#allocation11 + $0x8] sm:$0xff]  ;;  %v669_v43 = vld [vmem:[#allocation11] sm:$0xff] }
  0xb3   : > { %1466 = vmatprep.subr.mxu1 %v695_v22  ;;  %v564_v47 = vld [vmem:[#allocation8] sm:$0x3]  ;;  %v654_v58 = vld [vmem:[#allocation9 + $0x8] sm:$0xff]  ;;  %v653_v60 = vld [vmem:[#allocation9] sm:$0xff] }
  0xb4   : > { %1467 = vmatpush3.msra.mxu1 %v679_v23  ;;  %v569_v49 = vrot.slane %v564_v47, %v2236_v46  ;;  %v573_v50 = vrot.slane %v564_v47, %v2239_v48  ;;  %v656_v61 = vld [vmem:[#allocation9 + $0x18] sm:$0xff]  ;;  %v655_v2 = vld [vmem:[#allocation9 + $0x10] sm:$0xff]  ;;  %v777_v10 = vld [vmem:[#allocation12 + $0x8] sm:$0xff] }
  0xb5   : > { %1468 = vmatprep.subr.mxu1 %v694_v24  ;;  %1446 = vmatprep.mubr.msk.f32.mxu0 %vm866_vm1, %v777_v10  ;;  %v972_v11 = vld [vmem:[#allocation15 + $0xf8] sm:$0xff]  ;;  %v971_v12 = vld [vmem:[#allocation15 + $0xf0] sm:$0xff]  ;;  %v970_v14 = vld [vmem:[#allocation15 + $0xe8] sm:$0xff] }
  0xb6   : > { %1469 = vmatpush3.msra.mxu1 %v678_v25  ;;  %v969_v15 = vld [vmem:[#allocation15 + $0xe0] sm:$0xff]  ;;  %v968_v17 = vld [vmem:[#allocation15 + $0xd8] sm:$0xff]  ;;  %v967_v18 = vld [vmem:[#allocation15 + $0xd0] sm:$0xff] }
  0xb7   : > { %1470 = vmatprep.subr.mxu1 %v693_v26  ;;  %v778_v16 = vld [vmem:[%s2445_s7] sm:$0xff]  ;;  %v966_v19 = vld [vmem:[#allocation15 + $0xc8] sm:$0xff]  ;;  %v963_v22 = vld [vmem:[#allocation15 + $0xb0] sm:$0xff] }
  0xb8   : > { %1471 = vmatpush3.msra.mxu1 %v677_v27  ;;  %v965_v20 = vld [vmem:[#allocation15 + $0xc0] sm:$0xff]  ;;  %v964_v21 = vld [vmem:[#allocation15 + $0xb8] sm:$0xff]  ;;  %v962_v23 = vld [vmem:[#allocation15 + $0xa8] sm:$0xff] }
  0xb9   : > { %1472 = vmatprep.subr.mxu1 %v692_v28  ;;  %v961_v24 = vld [vmem:[#allocation15 + $0xa0] sm:$0xff]  ;;  %v960_v25 = vld [vmem:[#allocation15 + $0x98] sm:$0xff]  ;;  %v959_v26 = vld [vmem:[#allocation15 + $0x90] sm:$0xff] }
  0xba   : > { %1473 = vmatpush3.msra.mxu1 %v676_v29  ;;  %v958_v27 = vld [vmem:[#allocation15 + $0x88] sm:$0xff]  ;;  %v957_v28 = vld [vmem:[#allocation15 + $0x80] sm:$0xff]  ;;  %v956_v29 = vld [vmem:[#allocation15 + $0x78] sm:$0xff] }
  0xbb   : > { %1474 = vmatprep.subr.mxu1 %v691_v30  ;;  %v955_v30 = vld [vmem:[#allocation15 + $0x70] sm:$0xff] }
  0xbc   : > { %1475 = vmatpush3.msra.mxu1 %v675_v31  ;;  %v954_v31 = vld [vmem:[#allocation15 + $0x68] sm:$0xff] }
  0xbd   : > { %1476 = vmatprep.subr.mxu1 %v690_v32  ;;  %v953_v32 = vld [vmem:[#allocation15 + $0x60] sm:$0xff] }
  0xbe   : > { %1477 = vmatpush3.msra.mxu1 %v674_v33  ;;  %v952_v33 = vld [vmem:[#allocation15 + $0x58] sm:$0xff] }
  0xbf   : > { %1478 = vmatprep.subr.mxu1 %v689_v34  ;;  %v951_v34 = vld [vmem:[#allocation15 + $0x50] sm:$0xff] }
  0xc0   : > { %1479 = vmatpush3.msra.mxu1 %v673_v35  ;;  %v950_v35 = vld [vmem:[#allocation15 + $0x48] sm:$0xff] }
  0xc1   : > { %1480 = vmatprep.subr.mxu1 %v688_v36  ;;  %v949_v36 = vld [vmem:[#allocation15 + $0x40] sm:$0xff] }
  0xc2   : > { %1481 = vmatpush3.msra.mxu1 %v672_v37  ;;  %v948_v37 = vld [vmem:[#allocation15 + $0x38] sm:$0xff] }
  0xc3   : > { %1482 = vmatprep.subr.mxu1 %v687_v38  ;;  %v947_v38 = vld [vmem:[#allocation15 + $0x30] sm:$0xff] }
  0xc4   : > { %1483 = vmatpush3.msra.mxu1 %v671_v39  ;;  %v946_v39 = vld [vmem:[#allocation15 + $0x28] sm:$0xff] }
  0xc5   : > { %1484 = vmatprep.subr.mxu1 %v686_v40  ;;  %v2274_v40 = vsub.s32 7, %v2233_v45 }
  0xc6   : > { %1485 = vmatpush3.msra.mxu1 %v670_v41  ;;  %v779_v41 = vld [vmem:[#allocation14] sm:$0xff] }
  0xc7   : > { %1486 = vmatprep.subr.mxu1 %v685_v42  ;;  %v848_v42 = vrot.slane %v779_v41, %v2274_v40 }
  0xc8   : > { %1487 = vmatpush3.msra.mxu1 %v669_v43  ;;  %v2278_v43 = vsub.s32 6, %v2233_v45 }
  0xc9   : > { %973 = vmatprep.subr.mxu1 %v972_v11 }
 0x16e   : > { %v646_v51 = vpop.f32.mrf.mxu0 }
 0x16f   : > { %v647_v52 = vadd.f32 %v646_v51, %v569_v49  ;;  %v838_v51 = vrot.slane %v779_v41, %v2278_v43 }
 0x170   : > { %v648_v53 = vpop.f32.mrf.mxu0 }
 0x171   : > { %v651_v54 = vmax.f32 %v647_v52, 0.0  ;;  %v649_v55 = vadd.f32 %v648_v53, %v573_v50  ;;  %v2282_v52 = vsub.s32 5, %v2233_v45 }
 0x173   : > { %v652_v56 = vmax.f32 %v649_v55, 0.0  ;;  %v660_v57 = vrot.slane %v651_v54, %v2236_v46 }
 0x175   : > { %v664_v59 = vrot.slane %v652_v56, %v2236_v46  ;;  %v665_v63 = vmul.f32 %v660_v57, %v653_v60  ;;  %v667_v3 = vmul.f32 %v660_v57, %v655_v2  ;;  %v828_v57 = vrot.slane %v779_v41, %v2282_v52 }
 0x177   : > { %v666_v62 = vmul.f32 %v664_v59, %v654_v58  ;;  %v668_v1 = vmul.f32 %v664_v59, %v656_v61 }
 0x179   : > { %765 = vmatprep.mubr.f32.mxu1 %v666_v62  ;;  %v2289_v62 = vsub.s32 3, %v2233_v45 }
 0x17a   : > { %766 = vmatmul.mubr.f32.vlgmr.msra.gmra.mxu1 %v665_v63 }
 0x17b   : > { %770 = vmatprep.mubr.f32.mxu1 %v668_v1  ;;  %974 = vmatpush1.msra.mxu1 %v971_v12 }
 0x17c   : > { %975 = vmatprep.subr.mxu1 %v970_v14  ;;  %v798_v14 = vrot.slane %v779_v41, %v2239_v48 }
 0x17d   : > { %976 = vmatpush1.msra.mxu1 %v969_v15 }
 0x17e   : > { %771 = vmatmul.mubr.f32.gmra.mxu1 %v667_v3  ;;  %977 = vmatprep.subr.mxu1 %v968_v17  ;;  %v818_v3 = vrot.slane %v779_v41, %v2289_v62 }
 0x17f   : > { %1037 = vmatprep.mubr.f32.mxu1 %v1940_v0  ;;  %978 = vmatpush1.msra.mxu1 %v967_v18 }
 0x180   : > { %979 = vmatprep.subr.mxu1 %v966_v19 }
 0x181   : > { %980 = vmatpush1.msra.mxu1 %v965_v20  ;;  %v1445_v20 = vld [vmem:[#allocation14 + $0x8] ss:$0 sm:$0xff] }
 0x182   : > { %981 = vmatprep.subr.mxu1 %v964_v21 }
 0x183   : > { %982 = vmatpush1.msra.mxu1 %v963_v22 }
 0x184   : > { %983 = vmatprep.subr.mxu1 %v962_v23 }
 0x185   : > { %984 = vmatpush1.msra.mxu1 %v961_v24 }
 0x186   : > { %985 = vmatprep.subr.mxu1 %v960_v25 }
 0x187   : > { %986 = vmatpush1.msra.mxu1 %v959_v26  ;;  %v776_v26 = vld [vmem:[#allocation12] sm:$0xff] }
 0x188   : > { %987 = vmatprep.subr.mxu1 %v958_v27  ;;  %v945_v27 = vld [vmem:[#allocation15 + $0x20] sm:$0xff] }
 0x189   : > { %988 = vmatpush1.msra.mxu1 %v957_v28  ;;  %v944_v28 = vld [vmem:[#allocation15 + $0x18] sm:$0xff] }
 0x18a   : > { %989 = vmatprep.subr.mxu1 %v956_v29  ;;  %v943_v29 = vld [vmem:[#allocation15 + $0x10] sm:$0xff] }
 0x18b   : > { %990 = vmatpush1.msra.mxu1 %v955_v30  ;;  %v942_v30 = vld [vmem:[#allocation15 + $0x8] sm:$0xff] }
 0x18c   : > { %991 = vmatprep.subr.mxu1 %v954_v31  ;;  %v941_v31 = vld [vmem:[#allocation15] sm:$0xff] }
 0x18d   : > { %992 = vmatpush1.msra.mxu1 %v953_v32 }
 0x18e   : > { %993 = vmatprep.subr.mxu1 %v952_v33 }
 0x18f   : > { %994 = vmatpush1.msra.mxu1 %v951_v34 }
 0x190   : > { %995 = vmatprep.subr.mxu1 %v950_v35 }
 0x191   : > { %996 = vmatpush1.msra.mxu1 %v949_v36 }
 0x192   : > { %997 = vmatprep.subr.mxu1 %v948_v37 }
 0x193   : > { %998 = vmatpush1.msra.mxu1 %v947_v38  ;;  %v1045_v38 = vld [vmem:[%s2449_s11] sm:$0xf] }
 0x194   : > { %999 = vmatprep.subr.mxu1 %v946_v39  ;;  %v2343_v39 = vand.u32 127, %v566_v44  ;;  %v2360_v44 = vld [vmem:[%s2450_s12 + $0x8] sm:$0xff] }
 0x195   : > { %1000 = vmatpush1.msra.mxu1 %v945_v27 }
 0x196   : > { %1001 = vmatprep.subr.mxu1 %v944_v28  ;;  %vm1175_vm2 = vcmp.lt.s32.totalorder %v2343_v39, 111  ;;  %vm1158_vm3 = vcmp.lt.s32.totalorder %v2343_v39, 112  ;;  %vm1141_vm4 = vcmp.lt.s32.totalorder %v2343_v39, 113  ;;  %vm1124_vm5 = vcmp.lt.s32.totalorder %v2343_v39, 127 }
 0x197   : > { %1002 = vmatpush1.msra.mxu1 %v943_v29  ;;  %vm1107_vm6 = vcmp.lt.s32.totalorder %v2343_v39, 1  ;;  %vm1090_vm7 = vcmp.lt.s32.totalorder %v2343_v39, 15  ;;  %vm1073_vm8 = vcmp.lt.s32.totalorder %v2343_v39, 16  ;;  %vm1056_vm9 = vcmp.lt.s32.totalorder %v2343_v39, 17  ;;  %v1044_v39 = vld [vmem:[%s2448_s10] sm:$0xf] }
 0x198   : > { %1003 = vmatprep.subr.mxu1 %v942_v30 }
 0x199   : > { %1004 = vmatpush1.msra.mxu1 %v941_v31 }
 0x23a   : > { %v1488_v4 = vpop.f32.mrf.mxu1 }
 0x23c   : > { %v1489_v5 = vpop.f32.mrf.mxu1 }
 0x23d   : > { %v2250_v9 = vadd.f32 %v1489_v5, %v1488_v4  ;;  %v2295_v4 = vsub.s32 2, %v2233_v45 }
 0x23e   : > { %v1491_v6 = vpop.f32.mrf.mxu1 }
 0x23f   : > { %v808_v10 = vrot.slane %v779_v41, %v2295_v4 }
 0x240   : > { %v1492_v7 = vpop.f32.mrf.mxu1 }
 0x241   : > { %v2246_v8 = vadd.f32 %v1492_v7, %v1491_v6 }
 0x243   : > { %833 = vrot.lane.b32.xlu1 %v2246_v8, %s1941_s8  ;;  %843 = vrot.lane.b32.xlu0 %v2246_v8, %s1942_s9 }
 0x247   : > { %831 = vrot.lane.b32.xlu1 %v2250_v9, %s1941_s8  ;;  %841 = vrot.lane.b32.xlu0 %v2250_v9, %s1942_s9  ;;  %s1955_s8 = smov 17  }
 0x24b   : > { %821 = vrot.lane.b32.xlu1 %v2250_v9, %s1943_s16  ;;  %823 = vrot.lane.b32.xlu0 %v2246_v8, %s1943_s16 }
 0x24f   : > { %811 = vrot.lane.b32.xlu1 %v2250_v9, %s1944_s21  ;;  %813 = vrot.lane.b32.xlu0 %v2246_v8, %s1944_s21 }
 0x253   : > { %801 = vrot.lane.b32.xlu1 %v2250_v9, %s1945_s26  ;;  %803 = vrot.lane.b32.xlu0 %v2246_v8, %s1945_s26 }
 0x257   : > { %791 = vrot.lane.b32.xlu1 %v2250_v9, %s1946_s0  ;;  %793 = vrot.lane.b32.xlu0 %v2246_v8, %s1946_s0  ;;  %s1276_s0 = scalar_lea.sflag [#allocation5], %s2206_s4 }
 0x25b   : > { %781 = vrot.lane.b32.xlu1 %v2250_v9, %s1947_s19  ;;  %783 = vrot.lane.b32.xlu0 %v2246_v8, %s1947_s19 }
 0x25f   : > { %851 = vrot.lane.b32.xlu1 %v2250_v9, %s1949_s2  ;;  %853 = vrot.lane.b32.xlu0 %v2246_v8, %s1949_s2  ;;  %s1956_s2 = smov [#allocation17]  }
 0x260   : > { %s1850_s20 = sshll.u32 %s1956_s2, 4  ;;  %s1851_s20 = int_to_ptr.vmem [resolvable:$false] %s1850_s20 }
 0x263   : > { %863 = vperm.xlu0 %1631, %v778_v16   ;;  %v788_v16 = vrot.slane %v779_v41, %v2236_v46 }
 0x2b5   : > { %v834_v47 = vpop.permute.xlu1 %833  ;;  %v844_v49 = vpop.permute.xlu0 %843 }
 0x2b6   : > { %v850_v50 = vmul.f32 %v848_v42, %v844_v49  ;;  %v840_v56 = vmul.f32 %v838_v51, %v834_v47  ;;  %v1447_v47 = vld [vmem:[%s2450_s12 + $0x10] ss:$0 sm:$0xff]  ;;  %v1448_v49 = vld [vmem:[%s2450_s12 + $0x18] ss:$0 sm:$0xff] }
 0x2b8   : > { %871 = vmatpush1.msra.mxu0 %v850_v50  ;;  %v2355_v50 = vld [vmem:[%s2450_s12] sm:$0xff] }
 0x2b9   : > { %v832_v53 = vpop.permute.xlu1 %831  ;;  %v842_v54 = vpop.permute.xlu0 %841  ;;  %872 = vmatprep.subr.mxu0 %v1940_v0  ;;  %v1079_v31 = vrot.slane %v2355_v50, %v2239_v48 }
 0x2ba   : > { %v849_v55 = vmul.f32 %v848_v42, %v842_v54  ;;  %v839_v60 = vmul.f32 %v838_v51, %v832_v53 }
 0x2bc   : > { %873 = vmatpush1.msra.mxu0 %v849_v55 }
 0x2bd   : > { %v822_v58 = vpop.permute.xlu1 %821  ;;  %874 = vmatprep.subr.mxu0 %v1940_v0  ;;  %v824_v59 = vpop.permute.xlu0 %823 }
 0x2be   : > { %875 = vmatpush1.msra.mxu0 %v840_v56  ;;  %v830_v61 = vmul.f32 %v828_v57, %v824_v59  ;;  %v829_v2 = vmul.f32 %v828_v57, %v822_v58  ;;  %v1164_v58 = vrot.slane %v2355_v50, %v2274_v40  ;;  %v1168_v59 = vrot.slane %v2360_v44, %v2274_v40 }
 0x2bf   : > { %876 = vmatprep.subr.mxu0 %v1940_v0 }
 0x2c0   : > { %877 = vmatpush1.msra.mxu0 %v839_v60 }
 0x2c1   : > { %v812_v63 = vpop.permute.xlu1 %811  ;;  %878 = vmatprep.subr.mxu0 %v1940_v0  ;;  %v814_v1 = vpop.permute.xlu0 %813 }
 0x2c2   : > { %879 = vmatpush1.msra.mxu0 %v830_v61  ;;  %v820_v7 = vmul.f32 %v818_v3, %v814_v1  ;;  %v819_v12 = vmul.f32 %v818_v3, %v812_v63 }
 0x2c3   : > { %880 = vmatprep.subr.mxu0 %v1940_v0 }
 0x2c4   : > { %881 = vmatpush1.msra.mxu0 %v829_v2 }
 0x2c5   : > { %v802_v5 = vpop.permute.xlu1 %801  ;;  %882 = vmatprep.subr.mxu0 %v1940_v0  ;;  %v804_v6 = vpop.permute.xlu0 %803 }
 0x2c6   : > { %883 = vmatpush1.msra.mxu0 %v2246_v8  ;;  %v810_v13 = vmul.f32 %v808_v10, %v804_v6  ;;  %v809_v8 = vmul.f32 %v808_v10, %v802_v5  ;;  %v1147_v5 = vrot.slane %v2355_v50, %v2278_v43  ;;  %v1151_v6 = vrot.slane %v2360_v44, %v2278_v43 }
 0x2c7   : > { %884 = vmatprep.subr.mxu0 %v1940_v0 }
 0x2c8   : > { %885 = vmatpush1.msra.mxu0 %v2250_v9 }
 0x2c9   : > { %886 = vmatprep.subr.mxu0 %v1940_v0  ;;  %v794_v11 = vpop.permute.xlu0 %793  ;;  %v792_v45 = vpop.permute.xlu1 %791 }
 0x2ca   : > { %887 = vmatpush1.msra.mxu0 %v820_v7  ;;  %v800_v9 = vmul.f32 %v798_v14, %v794_v11  ;;  %v799_v18 = vmul.f32 %v798_v14, %v792_v45  ;;  %v1134_v14 = vrot.slane %v2360_v44, %v2282_v52 }
 0x2cb   : > { %888 = vmatprep.subr.mxu0 %v1940_v0 }
 0x2cc   : > { %889 = vmatpush1.msra.mxu0 %v819_v12 }
 0x2cd   : > { %890 = vmatprep.subr.mxu0 %v1940_v0  ;;  %v784_v15 = vpop.permute.xlu0 %783  ;;  %v782_v17 = vpop.permute.xlu1 %781 }
 0x2ce   : > { %891 = vmatpush1.msra.mxu0 %v810_v13  ;;  %v790_v19 = vmul.f32 %v788_v16, %v784_v15  ;;  %v789_v22 = vmul.f32 %v788_v16, %v782_v17  ;;  %v1130_v13 = vrot.slane %v2355_v50, %v2282_v52  ;;  %v1113_v17 = vrot.slane %v2355_v50, %v2289_v62 }
 0x2cf   : > { %892 = vmatprep.subr.mxu0 %v1940_v0 }
 0x2d0   : > { %893 = vmatpush1.msra.mxu0 %v809_v8 }
 0x2d1   : > { %894 = vmatprep.subr.mxu0 %v1940_v0  ;;  %v854_v21 = vpop.permute.xlu0 %853  ;;  %v852_v23 = vpop.permute.xlu1 %851 }
 0x2d2   : > { %895 = vmatpush1.msra.mxu0 %v800_v9  ;;  %v860_v24 = vmul.f32 %v1445_v20, %v854_v21  ;;  %v859_v25 = vmul.f32 %v1445_v20, %v852_v23 }
 0x2d3   : > { %896 = vmatprep.subr.mxu0 %v1940_v0 }
 0x2d4   : > { %897 = vmatpush1.msra.mxu0 %v799_v18  ;;  %v1117_v18 = vrot.slane %v2360_v44, %v2289_v62 }
 0x2d5   : > { %898 = vmatprep.subr.mxu0 %v1940_v0 }
 0x2d6   : > { %899 = vmatpush1.msra.mxu0 %v790_v19 }
 0x2d7   : > { %900 = vmatprep.subr.mxu0 %v1940_v0 }
 0x2d8   : > { %901 = vmatpush1.msra.mxu0 %v789_v22 }
 0x2d9   : > { %930 = vmatprep.subr.mxu0 %v1940_v0 }
 0x2da   : > { %931 = vmatpush2.msra.mxu0 %v860_v24  ;;  %v1096_v24 = vrot.slane %v2355_v50, %v2295_v4 }
 0x2db   : > { %932 = vmatprep.subr.mxu0 %v1940_v0 }
 0x2dc   : > { %933 = vmatpush2.msra.mxu0 %v859_v25  ;;  %v1100_v25 = vrot.slane %v2360_v44, %v2295_v4 }
 0x2dd   : > { %935 = vmatmul.mubr.f32.vlgmr.msra.gmra.mxu0 %v776_v26 }
 0x2de   : > { %1261 = vmatprep.mubr.f32.mxu0 %v1940_v0  ;;  %v864_v32 = vpop.permute.xlu0 %863 }
 0x39d   : > { %v936_v33 = vpop.f32.mrf.mxu0 }
 0x39e   : > { %v937_v34 = vadd.f32 %v936_v33, %v864_v32  ;;  %v1083_v32 = vrot.slane %v2360_v44, %v2239_v48 }
 0x39f   : > { %v938_v35 = vpop.f32.mrf.mxu0 }
 0x3a0   : > { %v940_v36 = vmax.f32 %v937_v34, 0.0 }
 0x3a2   : > { %1038 = vmatmul.mubr.f32.vlgmr.msra.gmra.mxu1 %v940_v36 }
 0x462   : > { %v2315_v37 = vpop.f32.mrf.mxu1 }
 0x463   : > { %1154 = vrot.lane.b32.xlu0 %v2315_v37, %s1950_s24  ;;  %1171 = vrot.lane.b32.xlu1 %v2315_v37, %s1951_s18 }
 0x464   : > { %v2319_v0 = vpop.f32.mrf.mxu1 }
 0x467   : > { %1137 = vrot.lane.b32.xlu0 %v2315_v37, %s1952_s5  ;;  %1173 = vrot.lane.b32.xlu1 %v2319_v0, %s1951_s18 }
 0x46b   : > { %1120 = vrot.lane.b32.xlu0 %v2315_v37, %s1943_s16  ;;  %1156 = vrot.lane.b32.xlu1 %v2319_v0, %s1950_s24 }
 0x46f   : > { %1103 = vrot.lane.b32.xlu0 %v2315_v37, %s1944_s21  ;;  %1139 = vrot.lane.b32.xlu1 %v2319_v0, %s1952_s5 }
 0x473   : > { %1086 = vrot.lane.b32.xlu0 %v2315_v37, %s1953_s6  ;;  %1122 = vrot.lane.b32.xlu1 %v2319_v0, %s1943_s16 }
 0x477   : > { %1069 = vrot.lane.b32.xlu0 %v2315_v37, %s1954_s3  ;;  %1105 = vrot.lane.b32.xlu1 %v2319_v0, %s1944_s21 }
 0x47b   : > { %1050 = vrot.lane.b32.xlu0 %v2315_v37, %s1955_s8  ;;  %1088 = vrot.lane.b32.xlu1 %v2319_v0, %s1953_s6  ;;  %s1443_s6 = sshll.u32 %s2206_s4, 3 }
 0x47f   : > { %1190 = vperm.xlu0 %1631, %v1045_v38   ;;  %1071 = vrot.lane.b32.xlu1 %v2319_v0, %s1954_s3  ;;  %s1455_s3 = sshll.u32 %s2051_s15, 7  ;;  %s1852_s15 = scalar_lea.vmem %s1851_s20, 256 }
 0x480   : > { %s1288_s21 = scalar_lea.hbm %s2451_s13, %s1455_s3 }
 0x483   : > { %1052 = vrot.lane.b32.xlu1 %v2319_v0, %s1955_s8  ;;  %s551_s8 = scalar_lea.vmem [#allocation17], %s1443_s6 }
 0x484   : > { %s1290_s9 = sshll.u32 %s551_s8, 4  ;;  %s1291_s9 = int_to_ptr.vmem [resolvable:$true] %s1290_s9 }
 0x485   : > { %s1846_s19 = scalar_lea.vmem %s1291_s9, 128  ;;  %p1853_p3 = scmp.lt.s32.totalorder %s1291_s9, %s1851_s20 }
 0x486   : > { %p1847_p10 = scmp.ne.s32.totalorder %s1291_s9, %s1846_s19  ;;  %p1854_p7 = scmp.lt.s32.totalorder %s1852_s15, %s1846_s19 }
 0x488   : > { %p1848_p0 = pnand %p1847_p10, %p2492_p11  ;;  %p1855_p9 = por %p1854_p7, %p1853_p3 }
 0x48a   : > { %p1849_p1 = pneg %p1848_p0 }
 0x48c   : > { %p1856_p6 = pnand %p1855_p9, %p1849_p1 }
 0x4d5   : > { %v1155_v41 = vpop.permute.xlu0 %1154  ;;  %v1172_v42 = vpop.permute.xlu1 %1171 }
 0x4d9   : > { %v1138_v51 = vpop.permute.xlu0 %1137  ;;  %v1174_v53 = vpop.permute.xlu1 %1173 }
 0x4da   : > { %v1176_v54 = vsel %vm1175_vm2, %v1172_v42, %v1174_v53  ;;  %v1177_v55 = vsel %vm1175_vm2, %v1174_v53, %v1172_v42 }
 0x4db   : > { %v1186_v56 = vmul.f32 %v1447_v47, %v1176_v54  ;;  %v1187_v57 = vmul.f32 %v1448_v49, %v1177_v55 }
 0x4dd   : > { %v1121_v60 = vpop.permute.xlu0 %1120  ;;  %1211 = vmatprep.subr.mxu0 %v1187_v57  ;;  %v1157_v61 = vpop.permute.xlu1 %1156 }
 0x4de   : > { %v1159_v63 = vsel %vm1158_vm3, %v1155_v41, %v1157_v61  ;;  %v1160_v1 = vsel %vm1158_vm3, %v1157_v61, %v1155_v41  ;;  %1212 = vmatpush1.msra.mxu0 %v1186_v56 }
 0x4df   : > { %v1169_v2 = vmul.f32 %v1164_v58, %v1159_v63  ;;  %v1170_v3 = vmul.f32 %v1168_v59, %v1160_v1 }
 0x4e1   : > { %1213 = vmatprep.subr.mxu0 %v1170_v3  ;;  %v1140_v7 = vpop.permute.xlu1 %1139  ;;  %v1104_v11 = vpop.permute.xlu0 %1103 }
 0x4e2   : > { %v1142_v10 = vsel %vm1141_vm4, %v1138_v51, %v1140_v7  ;;  %v1143_v40 = vsel %vm1141_vm4, %v1140_v7, %v1138_v51  ;;  %1214 = vmatpush1.msra.mxu0 %v1169_v2 }
 0x4e3   : > { %v1152_v12 = vmul.f32 %v1147_v5, %v1142_v10  ;;  %v1153_v45 = vmul.f32 %v1151_v6, %v1143_v40 }
 0x4e5   : > { %1215 = vmatprep.subr.mxu0 %v1153_v45  ;;  %v1123_v8 = vpop.permute.xlu1 %1122  ;;  %v1087_v19 = vpop.permute.xlu0 %1086 }
 0x4e6   : > { %v1125_v15 = vsel %vm1124_vm5, %v1121_v60, %v1123_v8  ;;  %v1126_v43 = vsel %vm1124_vm5, %v1123_v8, %v1121_v60  ;;  %1216 = vmatpush1.msra.mxu0 %v1152_v12 }
 0x4e7   : > { %v1135_v9 = vmul.f32 %v1130_v13, %v1125_v15  ;;  %v1136_v16 = vmul.f32 %v1134_v14, %v1126_v43 }
 0x4e9   : > { %1217 = vmatprep.subr.mxu0 %v1136_v16  ;;  %v1106_v20 = vpop.permute.xlu1 %1105  ;;  %v1070_v28 = vpop.permute.xlu0 %1069 }
 0x4ea   : > { %v1108_v21 = vsel %vm1107_vm6, %v1104_v11, %v1106_v20  ;;  %v1109_v52 = vsel %vm1107_vm6, %v1106_v20, %v1104_v11  ;;  %1218 = vmatpush1.msra.mxu0 %v1135_v9 }
 0x4eb   : > { %v1118_v22 = vmul.f32 %v1113_v17, %v1109_v52  ;;  %v1119_v23 = vmul.f32 %v1117_v18, %v1108_v21  ;;  %1219 = vmatprep.subr.mxu0 %v2319_v0  ;;  %v1066_v0 = vrot.slane %v2360_v44, %v2236_v46 }
 0x4ec   : > { %1220 = vmatpush1.msra.mxu0 %v2315_v37  ;;  %v1062_v37 = vrot.slane %v2355_v50, %v2236_v46 }
 0x4ed   : > { %1221 = vmatprep.subr.mxu0 %v1119_v23  ;;  %v1089_v62 = vpop.permute.xlu1 %1088  ;;  %v1051_v38 = vpop.permute.xlu0 %1050 }
 0x4ee   : > { %v1091_v26 = vsel %vm1090_vm7, %v1087_v19, %v1089_v62  ;;  %v1092_v27 = vsel %vm1090_vm7, %v1089_v62, %v1087_v19  ;;  %1222 = vmatpush1.msra.mxu0 %v1118_v22 }
 0x4ef   : > { %v1101_v29 = vmul.f32 %v1096_v24, %v1092_v27  ;;  %v1102_v30 = vmul.f32 %v1100_v25, %v1091_v26 }
 0x4f1   : > { %1223 = vmatprep.subr.mxu0 %v1102_v30  ;;  %v1072_v4 = vpop.permute.xlu1 %1071 }
 0x4f2   : > { %v1074_v33 = vsel %vm1073_vm8, %v1070_v28, %v1072_v4  ;;  %v1075_v34 = vsel %vm1073_vm8, %v1072_v4, %v1070_v28  ;;  %1224 = vmatpush1.msra.mxu0 %v1101_v29 }
 0x4f3   : > { %v1084_v35 = vmul.f32 %v1079_v31, %v1075_v34  ;;  %v1085_v36 = vmul.f32 %v1083_v32, %v1074_v33 }
 0x4f5   : > { %1225 = vmatprep.subr.mxu0 %v1085_v36  ;;  %v1053_v41 = vpop.permute.xlu1 %1052 }
 0x4f6   : > { %v1057_v42 = vsel %vm1056_vm9, %v1051_v38, %v1053_v41  ;;  %v1058_v48 = vsel %vm1056_vm9, %v1053_v41, %v1051_v38  ;;  %1226 = vmatpush1.msra.mxu0 %v1084_v35 }
 0x4f7   : > { %v1067_v47 = vmul.f32 %v1062_v37, %v1058_v48  ;;  %v1068_v49 = vmul.f32 %v1066_v0, %v1057_v42 }
 0x4f9   : > { %1227 = vmatprep.subr.mxu0 %v1068_v49 }
 0x4fa   : > { %1228 = vmatpush1.msra.mxu0 %v1067_v47  ;;  %v1191_v50 = vpop.permute.xlu0 %1190 }
 0x4fb   : > { %1449 = vmatmul.mubr.msk.f32.vlgmr.msra.gmra.mxu0 %vm1193_vm10, %v1044_v39 }
 0x5bb   : > { %v1263_v46 = vpop.f32.mrf.mxu0 }
 0x5bc   : > { %v1264_v44 = vadd.f32 %v1263_v46, %v1191_v50 }
 0x5bd   : > { %v1265_v51 = vpop.f32.mrf.mxu0 }
 0x5be   : > { %v1266_v53 = vadd.f32 %v1265_v51, %v1191_v50  ;;  %1632 = vtanh.f32 %v1264_v44 }
 0x5c0   : > { %1634 = vtanh.f32 %v1266_v53 }
 0x5cb   : > { %v1633_v54 = vpop.eup %1632 }
 0x5cd   : > { %v1635_v55 = vpop.eup %1634 }
 0x5ce   : > { %v1272_v56 = vcombine.low %v1633_v54, %v1635_v55 }
 0x5d0   : > { %1274 = vst [vmem:[%s551_s8] sm:$0xff] %v1272_v56 }
 0x5d1   : > { %1859 = shalt.err (!%p1856_p6)
}
 0x5d2   : > { %s1860_s17 = scalar_lea.hbm %s1288_s21, 128  ;;  %s1864_s18 = scalar_lea.hbm %s2451_s13, 256 }
 0x5d3   : > { %p1861_p12 = scmp.ne.s32.totalorder %s1288_s21, %s1860_s17  ;;  %p1865_p2 = scmp.lt.s32.totalorder %s1288_s21, %s2451_s13 }
 0x5d4   : > { %p1866_p5 = scmp.lt.s32.totalorder %s1864_s18, %s1860_s17 }
 0x5d5   : > { %p1862_p13 = pnand %p1861_p12, %p2492_p11 }
 0x5d6   : > { %p1867_p8 = por %p1866_p5, %p1865_p2 }
 0x5d7   : > { %p1863_p4 = pneg %p1862_p13 }
 0x5d9   : > { %p1868_p10 = pnand %p1867_p8, %p1863_p4 }
 0x5db   : > { %1871 = shalt.err (!%p1868_p10)
}
 0x5dc   : > { %1524 = dma.vmem_to_hbm [thread:$0]  (%p2492_p11), %s1291_s9, 128, %s1288_s21, %s1276_s0  }
 0x5dd PF: > { %s1302_s3 = sand.u32 1, %s1914_s27   ;;  %p2493_p0 = scmp.ne.s32.totalorder %s2480_s23, 0 }
 0x5de   : > { %p2494_p1 = scmp.ge.s32.totalorder %s1926_s30, 2  ;;  %s1303_s8 = scalar_lea.sflag [#allocation5], %s1302_s3 }
 0x5e0   : > { %p1553_p3 = pnand %p2494_p1, %p2493_p0 }
 0x5e2   : > { %p1554_p7 = pneg %p1553_p3 }
 0x5e4   : > { %1909 = dma.done.wait (%p1554_p7), %s1303_s8, 128  }
 0x5e5   : > { %1911 = vsyncadd (%p1554_p7), %s1303_s8, 4294967168  ;;  %p31_p9 = scmp.ge.s32.totalorder %s2149_s22, 4   ;;  %s2495_s27 = smov %s1918_s28 }
 0x5e6   : > { %s2496_s28 = smov %s1922_s29  ;;  %s2497_s29 = smov %s2161_s14 }
 0x5e7   : > { %s2498_s30 = smov %s2149_s22  ;;  %33 = sbr.rel (!%p31_p9) target bundleno = 18 (0x12), region = 145 }
 0x5ec   :  { %1308 = vsyncpa [#allocation4], 1 }
 0x5ed   :  { %1310 = vsyncpa [#allocation4 + $0x1], 1 }
 0x5ee   :  { %1311 = vsyncpa [#allocation7], 1 }
 0x5ef   :  { %1312 = vsyncpa [#allocation10], 1 }
 0x5f0   :  { %1313 = vsyncpa [#allocation13], 1 }
 0x5f1   :  { %1314 = vsyncpa [#allocation16], 1 }
 0x5f2   :  { %1315 = vsyncpa [#allocation5], 1 }
 0x5f3   :  { %1317 = vsyncpa [#allocation5 + $0x1], 1 }

</bundles_post_ra>
